<compile_context>
chip_gen: v6e
topology: v6e:2x2x1
jax: 0.10.0
libtpu: 0.0.40
codegen_flags: <defaults>
</compile_context>

<pallas_src>
import functools
import math

import jax
import jax.numpy as jnp
from jax.experimental import pallas as pl
from jax.experimental.pallas import tpu as pltpu

K_SIZES = (3, 5, 7, 9)      # k1..k4
PADDINGS = (1, 2, 3, 4)     # p1..p4  ("same" padding for odd kernels)
P_MAX = max(PADDINGS)       # 4
K_MAX = 2 * P_MAX + 1       # 9 (max tap window)
YOFF = 128                  # 128-aligned placement of y inside the conv2 scratch
BN_EPS = 1e-5


# --------------------------------------------------------------------------- kernel
def _basic_block_kernel(*args, stride, cin, l_out, has_proj):
  if has_proj:
    (xph_ref, scin_ref, mask_ref, psel_ref, pselT_ref,
     w1_ref, b1_ref, w2_ref, b2_ref, sew1_ref, sew2_ref,
     scw_ref, scb_ref, out_ref, ypad_ref) = args
  else:
    (xph_ref, scin_ref, mask_ref, psel_ref, pselT_ref,
     w1_ref, b1_ref, w2_ref, b2_ref, sew1_ref, sew2_ref,
     out_ref, ypad_ref) = args
    scw_ref = scb_ref = None

  f32 = jnp.float32
  bf16 = jnp.bfloat16
  cout, nl = out_ref.shape

  # ---- BranchConv1D #1 (+ folded BN1) + ReLU --------------------------------------
  # [R2] in-kernel im2col: tap t reads stride-phase (t % stride) at static lane offset
  # (t // stride); 9 accumulating bf16 MXU matmuls, f32 accumulation.
  acc = jnp.zeros((cout, nl), f32)
  for t in range(K_MAX):
    r, q = t % stride, t // stride
    xw = xph_ref[r, :, q:q + nl]                                       # (Cin, NL) bf16
    acc = acc + jnp.dot(w1_ref[t], xw, preferred_element_type=f32)
  y = jnp.maximum(acc + b1_ref[...], 0.0) * mask_ref[...]   # zero per-segment pad lanes
  # Dropout(drop_out_rate): eval-mode identity.
  # TODO(synk): train-mode BatchNorm / Dropout (batch stats, RNG mask) not implemented.

  # ---- BranchConv1D #2 (+ folded BN2) ----------------------------------------------
  # [R1] persistent VMEM scratch + 9 accumulating matmuls on shifted windows (no
  # (9*Cout, NL) slab).  y is stored at a 128-aligned offset (unmasked vst); the two
  # 4-lane edge zero stores stay unconditional (megacore-safe, see header note R9).
  ypad_ref[:, YOFF - P_MAX:YOFF] = jnp.zeros((cout, P_MAX), bf16)
  ypad_ref[:, YOFF + nl:YOFF + nl + P_MAX] = jnp.zeros((cout, P_MAX), bf16)
  ypad_ref[:, YOFF:YOFF + nl] = y.astype(bf16)
  zacc = jnp.zeros((cout, nl), f32)
  for t in range(K_MAX):
    off = YOFF - P_MAX + t
    zacc = zacc + jnp.dot(w2_ref[t], ypad_ref[:, off:off + nl],
                          preferred_element_type=f32)
  z = zacc + b2_ref[...]

  # ---- SELayer1D --------------------------------------------------------------------
  # [R8] per-batch-segment mean via bf16 0/1 selection matmul; exact 1/l_out scale in f32.
  alpha = jnp.dot(z.astype(bf16), psel_ref[...],
                  preferred_element_type=f32) * (1.0 / l_out)           # (Cout, G)
  h = jnp.maximum(jnp.dot(sew1_ref[...], alpha, preferred_element_type=f32), 0.0)
  gate = jax.nn.sigmoid(jnp.dot(sew2_ref[...], h, preferred_element_type=f32))
  gate_full = jnp.dot(gate.astype(bf16), pselT_ref[...],
                      preferred_element_type=f32)                        # (Cout, NL)
  z = z * gate_full

  # ---- shortcut (MaxPool done in wrapper) [+ folded 1x1 conv + BN] -------------------
  if has_proj:
    sc = jnp.dot(scw_ref[...], scin_ref[...], preferred_element_type=f32) + scb_ref[...]
  else:
    sc = scin_ref[...].astype(f32)

  out_ref[...] = jnp.maximum(z + sc, 0.0)


# --------------------------------------------------------------------------- wrapper
def _bn_fold(gamma, beta, mean, var):
  s = gamma * jax.lax.rsqrt(var + BN_EPS)
  return s, beta - mean * s


def _pack_branch_taps(w_list, scale):
  """Stack 4 branch conv weights (C/4, Cin, k_i) -> (K_MAX, Cout, Cin), BN scale folded."""
  ci = w_list[0].shape[1]
  cout = sum(int(w.shape[0]) for w in w_list)
  packed = jnp.zeros((K_MAX, cout, ci), jnp.float32)
  row = 0
  for (k, p, w) in zip(K_SIZES, PADDINGS, w_list):
    co = w.shape[0]
    packed = packed.at[P_MAX - p:P_MAX - p + k, row:row + co, :].set(
        jnp.transpose(w, (2, 0, 1)))
    row += co
  return packed * scale[None, :, None]


def basic_block_1d(x, raw, *, stride, lane_tile=1024,
                   vmem_limit_bytes=64 * 1024 * 1024):
  """x: (B, Cin, L) float32 (PyTorch NCL). Returns (B, Cout, ceil(L/stride)) float32.

  lane_tile: target lane width per grid step (v7x: 512, v5e/v6e: 1024-2048).
  vmem_limit_bytes: explicit Mosaic scoped-VMEM limit (v5e default is only 16 MiB).
  """
  f32, bf16 = jnp.float32, jnp.bfloat16
  B, cin, L = x.shape
  s = int(stride)
  l_out = -(-L // s)                          # ceil(L/stride) (ceil_mode-compatible)
  cout = raw["bn1"][0].shape[0]
  has_proj = (cin != cout)

  # ---- [R3] lane layout: segment width `seg`, batch-group size G --------------------
  # nl = G*seg is a multiple of 128 (lane-dense unmasked stores); G may not divide B
  # (last group zero-padded); NG >= 2 whenever B > 1 (v7x megacore sharding).
  seg_min = l_out + 2 * P_MAX
  g_cap = -(-B // 2) if B > 1 else 1
  G, seg = 1, -(-seg_min // 128) * 128
  for g in range(g_cap, 0, -1):
    step = 128 // math.gcd(g, 128)
    sg = -(-seg_min // step) * step
    if g * sg <= lane_tile:
      G, seg = g, sg
      break
  # TODO(synk): very long sequences (one segment > lane_tile) need a lane-chunked path.
  nl = G * seg
  NG = -(-B // G)
  b_pad = NG * G
  if b_pad != B:
    x = jnp.pad(x, ((0, b_pad - B), (0, 0), (0, 0)))

  # ---- fold BN + per-tap weight packing (wrapper-side; zero kernel cost) -------------
  s1, bb1 = _bn_fold(*raw["bn1"])
  s2, bb2 = _bn_fold(*raw["bn2"])
  w1p = _pack_branch_taps(raw["w1"], s1).astype(bf16)    # (9, Cout, Cin)
  w2p = _pack_branch_taps(raw["w2"], s2).astype(bf16)    # (9, Cout, Cout)
  b1 = bb1.reshape(cout, 1).astype(f32)
  b2 = bb2.reshape(cout, 1).astype(f32)

  # ---- [R2] conv1 input: stride-phase split + lane-folded padded slab -----------------
  # phase r holds xP[s*j + r]; tap t = s*q + r is read in-kernel at static lane offset q.
  q_max = (K_MAX - 1) // s
  phase_len = l_out + q_max
  need = s * phase_len
  xP = jnp.pad(x, ((0, 0), (0, 0),
                   (P_MAX, P_MAX + max(0, need - (L + 2 * P_MAX)))))
  ph = xP[:, :, :need].reshape(b_pad, cin, phase_len, s).transpose(0, 3, 1, 2)
  ph = jnp.pad(ph, ((0, 0), (0, 0), (0, 0), (0, seg - phase_len)))     # (b_pad, s, Cin, seg)
  xph = (ph.reshape(NG, G, s, cin, seg).transpose(0, 2, 3, 1, 4)
         .reshape(NG, s, cin, nl))
  xph = jnp.pad(xph, ((0, 0), (0, 0), (0, 0), (P_MAX, P_MAX))).astype(bf16)

  # ---- shortcut input: MaxPool1d(stride, ceil_mode=True) in the wrapper, bf16 [R7] ----
  if s != 1:
    xmp = jnp.pad(x, ((0, 0), (0, 0), (0, s * l_out - L)),
                  constant_values=-jnp.inf)
    scx = jnp.max(xmp.reshape(b_pad, cin, l_out, s), axis=-1)
  else:
    scx = x
  scx = jnp.pad(scx, ((0, 0), (0, 0), (P_MAX, seg - P_MAX - l_out)))   # (b_pad, Cin, seg)
  sc_in = (scx.reshape(NG, G, cin, seg).transpose(0, 2, 1, 3)
           .reshape(NG, cin, nl).astype(bf16))

  # ---- valid-lane mask + SE selection matrices (bf16 0/1) [R8] ------------------------
  seg_valid = jnp.zeros((seg,), f32).at[P_MAX:P_MAX + l_out].set(1.0)
  mask = jnp.tile(seg_valid, G).reshape(1, nl)
  psel = jnp.kron(jnp.eye(G, dtype=f32), seg_valid.reshape(seg, 1)).astype(bf16)   # (nl, G)
  pselT = jnp.kron(jnp.eye(G, dtype=f32), seg_valid.reshape(1, seg)).astype(bf16)  # (G, nl)

  inputs = [xph, sc_in, mask, psel, pselT, w1p, b1, w2p, b2,
            raw["se_w1"].astype(f32), raw["se_w2"].astype(f32)]
  if has_proj:
    ss, sb = _bn_fold(*raw["sc_bn"])
    scw = (raw["sc_w"] * ss[:, None]).astype(bf16)                     # (Cout, Cin)
    scb = (ss * raw["sc_b"] + sb).reshape(cout, 1).astype(f32)
    inputs += [scw, scb]

  def full_spec(a):
    return pl.BlockSpec(a.shape, lambda i, n=a.ndim: (0,) * n)

  in_specs = [pl.BlockSpec((None, s, cin, nl + 2 * P_MAX), lambda i: (i, 0, 0, 0)),
              pl.BlockSpec((None, cin, nl), lambda i: (i, 0, 0))]
  in_specs += [full_spec(a) for a in inputs[2:]]
  out_spec = pl.BlockSpec((None, cout, nl), lambda i: (i, 0, 0))

  kernel = functools.partial(_basic_block_kernel, stride=s, cin=cin,
                             l_out=l_out, has_proj=has_proj)
  out = pl.pallas_call(
      kernel,
      out_shape=jax.ShapeDtypeStruct((NG, cout, nl), f32),
      grid=(NG,),
      in_specs=in_specs,
      out_specs=out_spec,
      scratch_shapes=[pltpu.VMEM((cout, YOFF + nl + P_MAX), bf16)],
      compiler_params=pltpu.CompilerParams(
          dimension_semantics=("parallel",),
          vmem_limit_bytes=vmem_limit_bytes),
  )(*inputs)

  # layout plumbing: lift per-segment valid lanes back to (B, Cout, L_out).
  out = (out.reshape(NG, cout, G, seg).transpose(0, 2, 1, 3)
         .reshape(b_pad, cout, seg)[:B, :, P_MAX:P_MAX + l_out])
  return out


# --------------------------------------------------------------------------- reference
def _conv1d_ref(x, w, stride, pad):
  B, _, L = x.shape
  k = w.shape[-1]
  l_out = (L + 2 * pad - k) // stride + 1
  xp = jnp.pad(x, ((0, 0), (0, 0), (pad, pad)))
  out = jnp.zeros((B, w.shape[0], l_out), jnp.float32)
  for u in range(k):
    xs = xp[:, :, u:u + stride * (l_out - 1) + 1:stride]
    out = out + jnp.einsum("oc,bcl->bol", w[:, :, u], xs)
  return out


def basic_block_1d_reference(x, raw, *, stride):
  def bn(z, g, b, m, v):
    s = g * jax.lax.rsqrt(v + BN_EPS)
    return z * s[None, :, None] + (b - m * s)[None, :, None]

  def branch(xin, ws, s):
    return jnp.concatenate([_conv1d_ref(xin, w, s, p)
                            for (w, p) in zip(ws, PADDINGS)], axis=1)

  B, cin, L = x.shape
  cout = raw["bn1"][0].shape[0]
  l_out = -(-L // stride)

  y = jnp.maximum(bn(branch(x, raw["w1"], stride), *raw["bn1"]), 0.0)
  z = bn(branch(y, raw["w2"], 1), *raw["bn2"])
  alpha = jnp.mean(z, axis=-1)                                   # (B, Cout)
  h = jnp.maximum(alpha @ raw["se_w1"].T, 0.0)
  gate = jax.nn.sigmoid(h @ raw["se_w2"].T)
  z = z * gate[:, :, None]

  sc = x
  if stride != 1:
    xp = jnp.pad(x, ((0, 0), (0, 0), (0, stride * l_out - L)),
                 constant_values=-jnp.inf)
    sc = jnp.max(xp.reshape(B, cin, l_out, stride), axis=-1)
  if cin != cout:
    sc = jnp.einsum("oc,bcl->bol", raw["sc_w"], sc) + raw["sc_b"][None, :, None]
    sc = bn(sc, *raw["sc_bn"])
  return jnp.maximum(z + sc, 0.0)


# --------------------------------------------------------------------------- params
def init_params(key, cin, cout, reduction=16):
  """Deterministic synthetic parameters mirroring the PyTorch module shapes."""
  c4 = cout // 4
  cr = max(cout // reduction, 1)
  keys = iter(jax.random.split(key, 24))

  def conv_w(co, ci, k):
    return 0.1 * jax.random.normal(next(keys), (co, ci, k), jnp.float32)

  def bn_p(c):
    gamma = 1.0 + 0.1 * jax.random.normal(next(keys), (c,), jnp.float32)
    beta = 0.1 * jax.random.normal(next(keys), (c,), jnp.float32)
    mean = 0.1 * jax.random.normal(next(keys), (c,), jnp.float32)
    var = 1.0 + 0.1 * jnp.abs(jax.random.normal(next(keys), (c,), jnp.float32))
    return (gamma, beta, mean, var)

  return dict(
      w1=[conv_w(c4, cin, k) for k in K_SIZES], bn1=bn_p(cout),
      w2=[conv_w(c4, cout, k) for k in K_SIZES], bn2=bn_p(cout),
      se_w1=0.1 * jax.random.normal(next(keys), (cr, cout), jnp.float32),
      se_w2=0.1 * jax.random.normal(next(keys), (cout, cr), jnp.float32),
      sc_w=0.1 * jax.random.normal(next(keys), (cout, cin), jnp.float32),
      sc_b=0.1 * jax.random.normal(next(keys), (cout,), jnp.float32),
      sc_bn=bn_p(cout),
  )


if __name__ == "__main__":
  key = jax.random.PRNGKey(0)
  k_x1, k_p1, k_x2, k_p2 = jax.random.split(key, 4)
  drop_out_rate = 0.1  # eval mode -> identity

  # Case 1: projection shortcut (Cin != Cout) + MaxPool shortcut (stride=2).
  B, cin, cout, L, stride = 4, 4, 32, 16, 2
  x = jax.random.normal(k_x1, (B, cin, L), jnp.float32)
  raw = init_params(k_p1, cin, cout)
  out = basic_block_1d(x, raw, stride=stride)
  jax.block_until_ready(out)
  l_out = -(-L // stride)
  assert out.shape == (B, cout, l_out)
  assert bool(jnp.all(jnp.isfinite(out)))
  ref = basic_block_1d_reference(x, raw, stride=stride)
  err1 = float(jnp.max(jnp.abs(out - ref)))
  assert err1 < 5e-2, f"case1 max abs err vs f32 reference: {err1}"

  # Case 2: identity shortcut (Cin == Cout), stride=1.
  B2, c2, L2, stride2 = 4, 32, 16, 1
  x2 = jax.random.normal(k_x2, (B2, c2, L2), jnp.float32)
  raw2 = init_params(k_p2, c2, c2)
  out2 = basic_block_1d(x2, raw2, stride=stride2)
  jax.block_until_ready(out2)
  assert out2.shape == (B2, c2, L2)
  assert bool(jnp.all(jnp.isfinite(out2)))
  ref2 = basic_block_1d_reference(x2, raw2, stride=stride2)
  err2 = float(jnp.max(jnp.abs(out2 - ref2)))
  assert err2 < 5e-2, f"case2 max abs err vs f32 reference: {err2}"

  print("KERNEL_OK")
</pallas_src>

<mosaic_0001>
module attributes {stable_mosaic.version = 11 : i64} {
  func.func @_basic_block_kernel(%arg0: i32, %arg1: memref<1x2x4x136xbf16, #tpu.memory_space<vmem>>, %arg2: memref<1x4x128xbf16, #tpu.memory_space<vmem>>, %arg3: memref<1x128xf32, #tpu.memory_space<vmem>>, %arg4: memref<128x2xbf16, #tpu.memory_space<vmem>>, %arg5: memref<2x128xbf16, #tpu.memory_space<vmem>>, %arg6: memref<9x32x4xbf16, #tpu.memory_space<vmem>>, %arg7: memref<32x1xf32, #tpu.memory_space<vmem>>, %arg8: memref<9x32x32xbf16, #tpu.memory_space<vmem>>, %arg9: memref<32x1xf32, #tpu.memory_space<vmem>>, %arg10: memref<2x32xf32, #tpu.memory_space<vmem>>, %arg11: memref<32x2xf32, #tpu.memory_space<vmem>>, %arg12: memref<32x4xbf16, #tpu.memory_space<vmem>>, %arg13: memref<32x1xf32, #tpu.memory_space<vmem>>, %arg14: memref<1x32x128xf32, #tpu.memory_space<vmem>>, %arg15: memref<32x260xbf16, #tpu.memory_space<vmem>>) attributes {dimension_semantics = [#tpu.dimension_semantics<parallel>], iteration_bounds = array<i64: 2>, scalar_prefetch = 0 : i64, scratch_operands = 1 : i64, tpu.core_type = #tpu.core_type<tc>, window_params = [{transform_indices = @transform_0, window_bounds = array<i64: 1, 2, 4, 136>}, {transform_indices = @transform_1, window_bounds = array<i64: 1, 4, 128>}, {pipeline_mode = #tpu.pipeline_mode<synchronous>, transform_indices = @transform_2, window_bounds = array<i64: 1, 128>}, {pipeline_mode = #tpu.pipeline_mode<synchronous>, transform_indices = @transform_3, window_bounds = array<i64: 128, 2>}, {pipeline_mode = #tpu.pipeline_mode<synchronous>, transform_indices = @transform_4, window_bounds = array<i64: 2, 128>}, {pipeline_mode = #tpu.pipeline_mode<synchronous>, transform_indices = @transform_5, window_bounds = array<i64: 9, 32, 4>}, {pipeline_mode = #tpu.pipeline_mode<synchronous>, transform_indices = @transform_6, window_bounds = array<i64: 32, 1>}, {pipeline_mode = #tpu.pipeline_mode<synchronous>, transform_indices = @transform_7, window_bounds = array<i64: 9, 32, 32>}, {pipeline_mode = #tpu.pipeline_mode<synchronous>, transform_indices = @transform_8, window_bounds = array<i64: 32, 1>}, {pipeline_mode = #tpu.pipeline_mode<synchronous>, transform_indices = @transform_9, window_bounds = array<i64: 2, 32>}, {pipeline_mode = #tpu.pipeline_mode<synchronous>, transform_indices = @transform_10, window_bounds = array<i64: 32, 2>}, {pipeline_mode = #tpu.pipeline_mode<synchronous>, transform_indices = @transform_11, window_bounds = array<i64: 32, 4>}, {pipeline_mode = #tpu.pipeline_mode<synchronous>, transform_indices = @transform_12, window_bounds = array<i64: 32, 1>}, {transform_indices = @transform_13, window_bounds = array<i64: 1, 32, 128>}]} {
    %cst = arith.constant 0.000000e+00 : f32
    %0 = vector.broadcast %cst : f32 to vector<32x128xf32>
    %c0 = arith.constant 0 : index
    %c0_0 = arith.constant 0 : index
    %c0_1 = arith.constant 0 : index
    %c0_2 = arith.constant 0 : index
    %1 = vector.load %arg1[%c0, %c0_0, %c0_1, %c0_2] : memref<1x2x4x136xbf16, #tpu.memory_space<vmem>>, vector<1x1x4x128xbf16>
    %2 = vector.shape_cast %1 : vector<1x1x4x128xbf16> to vector<4x128xbf16>
    %c0_3 = arith.constant 0 : index
    %c0_4 = arith.constant 0 : index
    %c0_5 = arith.constant 0 : index
    %3 = vector.load %arg6[%c0_3, %c0_4, %c0_5] : memref<9x32x4xbf16, #tpu.memory_space<vmem>>, vector<1x32x4xbf16>
    %4 = vector.shape_cast %3 : vector<1x32x4xbf16> to vector<32x4xbf16>
    %cst_6 = arith.constant dense<0.000000e+00> : vector<32x128xf32>
    %5 = tpu.matmul %4, %2, %cst_6 {dimension_numbers = #tpu.dot_dimension_numbers<[1], [0], [0], [1], [0, 0, 1, 1], [], []>} : vector<32x4xbf16>, vector<4x128xbf16>, vector<32x128xf32> -> vector<32x128xf32>
    %6 = arith.addf %0, %5 : vector<32x128xf32>
    %c0_7 = arith.constant 0 : index
    %c1 = arith.constant 1 : index
    %c0_8 = arith.constant 0 : index
    %c0_9 = arith.constant 0 : index
    %7 = vector.load %arg1[%c0_7, %c1, %c0_8, %c0_9] : memref<1x2x4x136xbf16, #tpu.memory_space<vmem>>, vector<1x1x4x128xbf16>
    %8 = vector.shape_cast %7 : vector<1x1x4x128xbf16> to vector<4x128xbf16>
    %c1_10 = arith.constant 1 : index
    %c0_11 = arith.constant 0 : index
    %c0_12 = arith.constant 0 : index
    %9 = vector.load %arg6[%c1_10, %c0_11, %c0_12] : memref<9x32x4xbf16, #tpu.memory_space<vmem>>, vector<1x32x4xbf16>
    %10 = vector.shape_cast %9 : vector<1x32x4xbf16> to vector<32x4xbf16>
    %cst_13 = arith.constant dense<0.000000e+00> : vector<32x128xf32>
    %11 = tpu.matmul %10, %8, %cst_13 {dimension_numbers = #tpu.dot_dimension_numbers<[1], [0], [0], [1], [0, 0, 1, 1], [], []>} : vector<32x4xbf16>, vector<4x128xbf16>, vector<32x128xf32> -> vector<32x128xf32>
    %12 = arith.addf %6, %11 : vector<32x128xf32>
    %c0_14 = arith.constant 0 : index
    %c0_15 = arith.constant 0 : index
    %c0_16 = arith.constant 0 : index
    %c1_17 = arith.constant 1 : index
    %13 = vector.load %arg1[%c0_14, %c0_15, %c0_16, %c1_17] : memref<1x2x4x136xbf16, #tpu.memory_space<vmem>>, vector<1x1x4x128xbf16>
    %14 = vector.shape_cast %13 : vector<1x1x4x128xbf16> to vector<4x128xbf16>
    %c2 = arith.constant 2 : index
    %c0_18 = arith.constant 0 : index
    %c0_19 = arith.constant 0 : index
    %15 = vector.load %arg6[%c2, %c0_18, %c0_19] : memref<9x32x4xbf16, #tpu.memory_space<vmem>>, vector<1x32x4xbf16>
    %16 = vector.shape_cast %15 : vector<1x32x4xbf16> to vector<32x4xbf16>
    %cst_20 = arith.constant dense<0.000000e+00> : vector<32x128xf32>
    %17 = tpu.matmul %16, %14, %cst_20 {dimension_numbers = #tpu.dot_dimension_numbers<[1], [0], [0], [1], [0, 0, 1, 1], [], []>} : vector<32x4xbf16>, vector<4x128xbf16>, vector<32x128xf32> -> vector<32x128xf32>
    %18 = arith.addf %12, %17 : vector<32x128xf32>
    %c0_21 = arith.constant 0 : index
    %c1_22 = arith.constant 1 : index
    %c0_23 = arith.constant 0 : index
    %c1_24 = arith.constant 1 : index
    %19 = vector.load %arg1[%c0_21, %c1_22, %c0_23, %c1_24] : memref<1x2x4x136xbf16, #tpu.memory_space<vmem>>, vector<1x1x4x128xbf16>
    %20 = vector.shape_cast %19 : vector<1x1x4x128xbf16> to vector<4x128xbf16>
    %c3 = arith.constant 3 : index
    %c0_25 = arith.constant 0 : index
    %c0_26 = arith.constant 0 : index
    %21 = vector.load %arg6[%c3, %c0_25, %c0_26] : memref<9x32x4xbf16, #tpu.memory_space<vmem>>, vector<1x32x4xbf16>
    %22 = vector.shape_cast %21 : vector<1x32x4xbf16> to vector<32x4xbf16>
    %cst_27 = arith.constant dense<0.000000e+00> : vector<32x128xf32>
    %23 = tpu.matmul %22, %20, %cst_27 {dimension_numbers = #tpu.dot_dimension_numbers<[1], [0], [0], [1], [0, 0, 1, 1], [], []>} : vector<32x4xbf16>, vector<4x128xbf16>, vector<32x128xf32> -> vector<32x128xf32>
    %24 = arith.addf %18, %23 : vector<32x128xf32>
    %c0_28 = arith.constant 0 : index
    %c0_29 = arith.constant 0 : index
    %c0_30 = arith.constant 0 : index
    %c2_31 = arith.constant 2 : index
    %25 = vector.load %arg1[%c0_28, %c0_29, %c0_30, %c2_31] : memref<1x2x4x136xbf16, #tpu.memory_space<vmem>>, vector<1x1x4x128xbf16>
    %26 = vector.shape_cast %25 : vector<1x1x4x128xbf16> to vector<4x128xbf16>
    %c4 = arith.constant 4 : index
    %c0_32 = arith.constant 0 : index
    %c0_33 = arith.constant 0 : index
    %27 = vector.load %arg6[%c4, %c0_32, %c0_33] : memref<9x32x4xbf16, #tpu.memory_space<vmem>>, vector<1x32x4xbf16>
    %28 = vector.shape_cast %27 : vector<1x32x4xbf16> to vector<32x4xbf16>
    %cst_34 = arith.constant dense<0.000000e+00> : vector<32x128xf32>
    %29 = tpu.matmul %28, %26, %cst_34 {dimension_numbers = #tpu.dot_dimension_numbers<[1], [0], [0], [1], [0, 0, 1, 1], [], []>} : vector<32x4xbf16>, vector<4x128xbf16>, vector<32x128xf32> -> vector<32x128xf32>
    %30 = arith.addf %24, %29 : vector<32x128xf32>
    %c0_35 = arith.constant 0 : index
    %c1_36 = arith.constant 1 : index
    %c0_37 = arith.constant 0 : index
    %c2_38 = arith.constant 2 : index
    %31 = vector.load %arg1[%c0_35, %c1_36, %c0_37, %c2_38] : memref<1x2x4x136xbf16, #tpu.memory_space<vmem>>, vector<1x1x4x128xbf16>
    %32 = vector.shape_cast %31 : vector<1x1x4x128xbf16> to vector<4x128xbf16>
    %c5 = arith.constant 5 : index
    %c0_39 = arith.constant 0 : index
    %c0_40 = arith.constant 0 : index
    %33 = vector.load %arg6[%c5, %c0_39, %c0_40] : memref<9x32x4xbf16, #tpu.memory_space<vmem>>, vector<1x32x4xbf16>
    %34 = vector.shape_cast %33 : vector<1x32x4xbf16> to vector<32x4xbf16>
    %cst_41 = arith.constant dense<0.000000e+00> : vector<32x128xf32>
    %35 = tpu.matmul %34, %32, %cst_41 {dimension_numbers = #tpu.dot_dimension_numbers<[1], [0], [0], [1], [0, 0, 1, 1], [], []>} : vector<32x4xbf16>, vector<4x128xbf16>, vector<32x128xf32> -> vector<32x128xf32>
    %36 = arith.addf %30, %35 : vector<32x128xf32>
    %c0_42 = arith.constant 0 : index
    %c0_43 = arith.constant 0 : index
    %c0_44 = arith.constant 0 : index
    %c3_45 = arith.constant 3 : index
    %37 = vector.load %arg1[%c0_42, %c0_43, %c0_44, %c3_45] : memref<1x2x4x136xbf16, #tpu.memory_space<vmem>>, vector<1x1x4x128xbf16>
    %38 = vector.shape_cast %37 : vector<1x1x4x128xbf16> to vector<4x128xbf16>
    %c6 = arith.constant 6 : index
    %c0_46 = arith.constant 0 : index
    %c0_47 = arith.constant 0 : index
    %39 = vector.load %arg6[%c6, %c0_46, %c0_47] : memref<9x32x4xbf16, #tpu.memory_space<vmem>>, vector<1x32x4xbf16>
    %40 = vector.shape_cast %39 : vector<1x32x4xbf16> to vector<32x4xbf16>
    %cst_48 = arith.constant dense<0.000000e+00> : vector<32x128xf32>
    %41 = tpu.matmul %40, %38, %cst_48 {dimension_numbers = #tpu.dot_dimension_numbers<[1], [0], [0], [1], [0, 0, 1, 1], [], []>} : vector<32x4xbf16>, vector<4x128xbf16>, vector<32x128xf32> -> vector<32x128xf32>
    %42 = arith.addf %36, %41 : vector<32x128xf32>
    %c0_49 = arith.constant 0 : index
    %c1_50 = arith.constant 1 : index
    %c0_51 = arith.constant 0 : index
    %c3_52 = arith.constant 3 : index
    %43 = vector.load %arg1[%c0_49, %c1_50, %c0_51, %c3_52] : memref<1x2x4x136xbf16, #tpu.memory_space<vmem>>, vector<1x1x4x128xbf16>
    %44 = vector.shape_cast %43 : vector<1x1x4x128xbf16> to vector<4x128xbf16>
    %c7 = arith.constant 7 : index
    %c0_53 = arith.constant 0 : index
    %c0_54 = arith.constant 0 : index
    %45 = vector.load %arg6[%c7, %c0_53, %c0_54] : memref<9x32x4xbf16, #tpu.memory_space<vmem>>, vector<1x32x4xbf16>
    %46 = vector.shape_cast %45 : vector<1x32x4xbf16> to vector<32x4xbf16>
    %cst_55 = arith.constant dense<0.000000e+00> : vector<32x128xf32>
    %47 = tpu.matmul %46, %44, %cst_55 {dimension_numbers = #tpu.dot_dimension_numbers<[1], [0], [0], [1], [0, 0, 1, 1], [], []>} : vector<32x4xbf16>, vector<4x128xbf16>, vector<32x128xf32> -> vector<32x128xf32>
    %48 = arith.addf %42, %47 : vector<32x128xf32>
    %c0_56 = arith.constant 0 : index
    %c0_57 = arith.constant 0 : index
    %c0_58 = arith.constant 0 : index
    %c4_59 = arith.constant 4 : index
    %49 = vector.load %arg1[%c0_56, %c0_57, %c0_58, %c4_59] : memref<1x2x4x136xbf16, #tpu.memory_space<vmem>>, vector<1x1x4x128xbf16>
    %50 = vector.shape_cast %49 : vector<1x1x4x128xbf16> to vector<4x128xbf16>
    %c8 = arith.constant 8 : index
    %c0_60 = arith.constant 0 : index
    %c0_61 = arith.constant 0 : index
    %51 = vector.load %arg6[%c8, %c0_60, %c0_61] : memref<9x32x4xbf16, #tpu.memory_space<vmem>>, vector<1x32x4xbf16>
    %52 = vector.shape_cast %51 : vector<1x32x4xbf16> to vector<32x4xbf16>
    %cst_62 = arith.constant dense<0.000000e+00> : vector<32x128xf32>
    %53 = tpu.matmul %52, %50, %cst_62 {dimension_numbers = #tpu.dot_dimension_numbers<[1], [0], [0], [1], [0, 0, 1, 1], [], []>} : vector<32x4xbf16>, vector<4x128xbf16>, vector<32x128xf32> -> vector<32x128xf32>
    %54 = arith.addf %48, %53 : vector<32x128xf32>
    %c0_63 = arith.constant 0 : index
    %c0_64 = arith.constant 0 : index
    %55 = vector.load %arg7[%c0_63, %c0_64] : memref<32x1xf32, #tpu.memory_space<vmem>>, vector<32x1xf32>
    %56 = vector.broadcast %55 : vector<32x1xf32> to vector<32x128xf32>
    %57 = arith.addf %54, %56 : vector<32x128xf32>
    %cst_65 = arith.constant 0.000000e+00 : f32
    %58 = vector.broadcast %cst_65 : f32 to vector<32x128xf32>
    %59 = arith.maximumf %57, %58 : vector<32x128xf32>
    %c0_66 = arith.constant 0 : index
    %c0_67 = arith.constant 0 : index
    %60 = vector.load %arg3[%c0_66, %c0_67] : memref<1x128xf32, #tpu.memory_space<vmem>>, vector<1x128xf32>
    %61 = vector.broadcast %60 : vector<1x128xf32> to vector<32x128xf32>
    %62 = arith.mulf %59, %61 : vector<32x128xf32>
    %cst_68 = arith.constant 0.000000e+00 : bf16
    %63 = vector.broadcast %cst_68 : bf16 to vector<32x4xbf16>
    %c0_69 = arith.constant 0 : index
    %c124 = arith.constant 124 : index
    %64 = vector.load %arg15[%c0_69, %c124] : memref<32x260xbf16, #tpu.memory_space<vmem>>, vector<32x4xbf16>
    tpu.vector_store %arg15[%c0_69, %c124], %63 {strides = array<i32>} : memref<32x260xbf16, #tpu.memory_space<vmem>>, vector<32x4xbf16>,
    %cst_70 = arith.constant 0.000000e+00 : bf16
    %65 = vector.broadcast %cst_70 : bf16 to vector<32x4xbf16>
    %c0_71 = arith.constant 0 : index
    %c256 = arith.constant 256 : index
    %66 = vector.load %arg15[%c0_71, %c256] : memref<32x260xbf16, #tpu.memory_space<vmem>>, vector<32x4xbf16>
    tpu.vector_store %arg15[%c0_71, %c256], %65 {strides = array<i32>} : memref<32x260xbf16, #tpu.memory_space<vmem>>, vector<32x4xbf16>,
    %67 = arith.truncf %62 : vector<32x128xf32> to vector<32x128xbf16>
    %c0_72 = arith.constant 0 : index
    %c128 = arith.constant 128 : index
    %68 = vector.load %arg15[%c0_72, %c128] : memref<32x260xbf16, #tpu.memory_space<vmem>>, vector<32x128xbf16>
    tpu.vector_store %arg15[%c0_72, %c128], %67 {strides = array<i32>} : memref<32x260xbf16, #tpu.memory_space<vmem>>, vector<32x128xbf16>,
    %cst_73 = arith.constant 0.000000e+00 : f32
    %69 = vector.broadcast %cst_73 : f32 to vector<32x128xf32>
    %c0_74 = arith.constant 0 : index
    %c0_75 = arith.constant 0 : index
    %c0_76 = arith.constant 0 : index
    %70 = vector.load %arg8[%c0_74, %c0_75, %c0_76] : memref<9x32x32xbf16, #tpu.memory_space<vmem>>, vector<1x32x32xbf16>
    %71 = vector.shape_cast %70 : vector<1x32x32xbf16> to vector<32x32xbf16>
    %c0_77 = arith.constant 0 : index
    %c124_78 = arith.constant 124 : index
    %72 = vector.load %arg15[%c0_77, %c124_78] : memref<32x260xbf16, #tpu.memory_space<vmem>>, vector<32x128xbf16>
    %cst_79 = arith.constant dense<0.000000e+00> : vector<32x128xf32>
    %73 = tpu.matmul %71, %72, %cst_79 {dimension_numbers = #tpu.dot_dimension_numbers<[1], [0], [0], [1], [0, 0, 1, 1], [], []>} : vector<32x32xbf16>, vector<32x128xbf16>, vector<32x128xf32> -> vector<32x128xf32>
    %74 = arith.addf %69, %73 : vector<32x128xf32>
    %c1_80 = arith.constant 1 : index
    %c0_81 = arith.constant 0 : index
    %c0_82 = arith.constant 0 : index
    %75 = vector.load %arg8[%c1_80, %c0_81, %c0_82] : memref<9x32x32xbf16, #tpu.memory_space<vmem>>, vector<1x32x32xbf16>
    %76 = vector.shape_cast %75 : vector<1x32x32xbf16> to vector<32x32xbf16>
    %c0_83 = arith.constant 0 : index
    %c125 = arith.constant 125 : index
    %77 = vector.load %arg15[%c0_83, %c125] : memref<32x260xbf16, #tpu.memory_space<vmem>>, vector<32x128xbf16>
    %cst_84 = arith.constant dense<0.000000e+00> : vector<32x128xf32>
    %78 = tpu.matmul %76, %77, %cst_84 {dimension_numbers = #tpu.dot_dimension_numbers<[1], [0], [0], [1], [0, 0, 1, 1], [], []>} : vector<32x32xbf16>, vector<32x128xbf16>, vector<32x128xf32> -> vector<32x128xf32>
    %79 = arith.addf %74, %78 : vector<32x128xf32>
    %c2_85 = arith.constant 2 : index
    %c0_86 = arith.constant 0 : index
    %c0_87 = arith.constant 0 : index
    %80 = vector.load %arg8[%c2_85, %c0_86, %c0_87] : memref<9x32x32xbf16, #tpu.memory_space<vmem>>, vector<1x32x32xbf16>
    %81 = vector.shape_cast %80 : vector<1x32x32xbf16> to vector<32x32xbf16>
    %c0_88 = arith.constant 0 : index
    %c126 = arith.constant 126 : index
    %82 = vector.load %arg15[%c0_88, %c126] : memref<32x260xbf16, #tpu.memory_space<vmem>>, vector<32x128xbf16>
    %cst_89 = arith.constant dense<0.000000e+00> : vector<32x128xf32>
    %83 = tpu.matmul %81, %82, %cst_89 {dimension_numbers = #tpu.dot_dimension_numbers<[1], [0], [0], [1], [0, 0, 1, 1], [], []>} : vector<32x32xbf16>, vector<32x128xbf16>, vector<32x128xf32> -> vector<32x128xf32>
    %84 = arith.addf %79, %83 : vector<32x128xf32>
    %c3_90 = arith.constant 3 : index
    %c0_91 = arith.constant 0 : index
    %c0_92 = arith.constant 0 : index
    %85 = vector.load %arg8[%c3_90, %c0_91, %c0_92] : memref<9x32x32xbf16, #tpu.memory_space<vmem>>, vector<1x32x32xbf16>
    %86 = vector.shape_cast %85 : vector<1x32x32xbf16> to vector<32x32xbf16>
    %c0_93 = arith.constant 0 : index
    %c127 = arith.constant 127 : index
    %87 = vector.load %arg15[%c0_93, %c127] : memref<32x260xbf16, #tpu.memory_space<vmem>>, vector<32x128xbf16>
    %cst_94 = arith.constant dense<0.000000e+00> : vector<32x128xf32>
    %88 = tpu.matmul %86, %87, %cst_94 {dimension_numbers = #tpu.dot_dimension_numbers<[1], [0], [0], [1], [0, 0, 1, 1], [], []>} : vector<32x32xbf16>, vector<32x128xbf16>, vector<32x128xf32> -> vector<32x128xf32>
    %89 = arith.addf %84, %88 : vector<32x128xf32>
    %c4_95 = arith.constant 4 : index
    %c0_96 = arith.constant 0 : index
    %c0_97 = arith.constant 0 : index
    %90 = vector.load %arg8[%c4_95, %c0_96, %c0_97] : memref<9x32x32xbf16, #tpu.memory_space<vmem>>, vector<1x32x32xbf16>
    %91 = vector.shape_cast %90 : vector<1x32x32xbf16> to vector<32x32xbf16>
    %c0_98 = arith.constant 0 : index
    %c128_99 = arith.constant 128 : index
    %92 = vector.load %arg15[%c0_98, %c128_99] : memref<32x260xbf16, #tpu.memory_space<vmem>>, vector<32x128xbf16>
    %cst_100 = arith.constant dense<0.000000e+00> : vector<32x128xf32>
    %93 = tpu.matmul %91, %92, %cst_100 {dimension_numbers = #tpu.dot_dimension_numbers<[1], [0], [0], [1], [0, 0, 1, 1], [], []>} : vector<32x32xbf16>, vector<32x128xbf16>, vector<32x128xf32> -> vector<32x128xf32>
    %94 = arith.addf %89, %93 : vector<32x128xf32>
    %c5_101 = arith.constant 5 : index
    %c0_102 = arith.constant 0 : index
    %c0_103 = arith.constant 0 : index
    %95 = vector.load %arg8[%c5_101, %c0_102, %c0_103] : memref<9x32x32xbf16, #tpu.memory_space<vmem>>, vector<1x32x32xbf16>
    %96 = vector.shape_cast %95 : vector<1x32x32xbf16> to vector<32x32xbf16>
    %c0_104 = arith.constant 0 : index
    %c129 = arith.constant 129 : index
    %97 = vector.load %arg15[%c0_104, %c129] : memref<32x260xbf16, #tpu.memory_space<vmem>>, vector<32x128xbf16>
    %cst_105 = arith.constant dense<0.000000e+00> : vector<32x128xf32>
    %98 = tpu.matmul %96, %97, %cst_105 {dimension_numbers = #tpu.dot_dimension_numbers<[1], [0], [0], [1], [0, 0, 1, 1], [], []>} : vector<32x32xbf16>, vector<32x128xbf16>, vector<32x128xf32> -> vector<32x128xf32>
    %99 = arith.addf %94, %98 : vector<32x128xf32>
    %c6_106 = arith.constant 6 : index
    %c0_107 = arith.constant 0 : index
    %c0_108 = arith.constant 0 : index
    %100 = vector.load %arg8[%c6_106, %c0_107, %c0_108] : memref<9x32x32xbf16, #tpu.memory_space<vmem>>, vector<1x32x32xbf16>
    %101 = vector.shape_cast %100 : vector<1x32x32xbf16> to vector<32x32xbf16>
    %c0_109 = arith.constant 0 : index
    %c130 = arith.constant 130 : index
    %102 = vector.load %arg15[%c0_109, %c130] : memref<32x260xbf16, #tpu.memory_space<vmem>>, vector<32x128xbf16>
    %cst_110 = arith.constant dense<0.000000e+00> : vector<32x128xf32>
    %103 = tpu.matmul %101, %102, %cst_110 {dimension_numbers = #tpu.dot_dimension_numbers<[1], [0], [0], [1], [0, 0, 1, 1], [], []>} : vector<32x32xbf16>, vector<32x128xbf16>, vector<32x128xf32> -> vector<32x128xf32>
    %104 = arith.addf %99, %103 : vector<32x128xf32>
    %c7_111 = arith.constant 7 : index
    %c0_112 = arith.constant 0 : index
    %c0_113 = arith.constant 0 : index
    %105 = vector.load %arg8[%c7_111, %c0_112, %c0_113] : memref<9x32x32xbf16, #tpu.memory_space<vmem>>, vector<1x32x32xbf16>
    %106 = vector.shape_cast %105 : vector<1x32x32xbf16> to vector<32x32xbf16>
    %c0_114 = arith.constant 0 : index
    %c131 = arith.constant 131 : index
    %107 = vector.load %arg15[%c0_114, %c131] : memref<32x260xbf16, #tpu.memory_space<vmem>>, vector<32x128xbf16>
    %cst_115 = arith.constant dense<0.000000e+00> : vector<32x128xf32>
    %108 = tpu.matmul %106, %107, %cst_115 {dimension_numbers = #tpu.dot_dimension_numbers<[1], [0], [0], [1], [0, 0, 1, 1], [], []>} : vector<32x32xbf16>, vector<32x128xbf16>, vector<32x128xf32> -> vector<32x128xf32>
    %109 = arith.addf %104, %108 : vector<32x128xf32>
    %c8_116 = arith.constant 8 : index
    %c0_117 = arith.constant 0 : index
    %c0_118 = arith.constant 0 : index
    %110 = vector.load %arg8[%c8_116, %c0_117, %c0_118] : memref<9x32x32xbf16, #tpu.memory_space<vmem>>, vector<1x32x32xbf16>
    %111 = vector.shape_cast %110 : vector<1x32x32xbf16> to vector<32x32xbf16>
    %c0_119 = arith.constant 0 : index
    %c132 = arith.constant 132 : index
    %112 = vector.load %arg15[%c0_119, %c132] : memref<32x260xbf16, #tpu.memory_space<vmem>>, vector<32x128xbf16>
    %cst_120 = arith.constant dense<0.000000e+00> : vector<32x128xf32>
    %113 = tpu.matmul %111, %112, %cst_120 {dimension_numbers = #tpu.dot_dimension_numbers<[1], [0], [0], [1], [0, 0, 1, 1], [], []>} : vector<32x32xbf16>, vector<32x128xbf16>, vector<32x128xf32> -> vector<32x128xf32>
    %114 = arith.addf %109, %113 : vector<32x128xf32>
    %c0_121 = arith.constant 0 : index
    %c0_122 = arith.constant 0 : index
    %115 = vector.load %arg9[%c0_121, %c0_122] : memref<32x1xf32, #tpu.memory_space<vmem>>, vector<32x1xf32>
    %116 = vector.broadcast %115 : vector<32x1xf32> to vector<32x128xf32>
    %117 = arith.addf %114, %116 : vector<32x128xf32>
    %118 = arith.truncf %117 : vector<32x128xf32> to vector<32x128xbf16>
    %c0_123 = arith.constant 0 : index
    %c0_124 = arith.constant 0 : index
    %119 = vector.load %arg4[%c0_123, %c0_124] : memref<128x2xbf16, #tpu.memory_space<vmem>>, vector<128x2xbf16>
    %cst_125 = arith.constant dense<0.000000e+00> : vector<32x2xf32>
    %120 = tpu.matmul %118, %119, %cst_125 {dimension_numbers = #tpu.dot_dimension_numbers<[1], [0], [0], [1], [0, 0, 1, 1], [], []>} : vector<32x128xbf16>, vector<128x2xbf16>, vector<32x2xf32> -> vector<32x2xf32>
    %cst_126 = arith.constant 1.250000e-01 : f32
    %121 = vector.broadcast %cst_126 : f32 to vector<32x2xf32>
    %122 = arith.mulf %120, %121 : vector<32x2xf32>
    %c0_127 = arith.constant 0 : index
    %c0_128 = arith.constant 0 : index
    %123 = vector.load %arg10[%c0_127, %c0_128] : memref<2x32xf32, #tpu.memory_space<vmem>>, vector<2x32xf32>
    %cst_129 = arith.constant dense<0.000000e+00> : vector<2x2xf32>
    %124 = tpu.matmul %123, %122, %cst_129 {dimension_numbers = #tpu.dot_dimension_numbers<[1], [0], [0], [1], [0, 0, 1, 1], [], []>} : vector<2x32xf32>, vector<32x2xf32>, vector<2x2xf32> -> vector<2x2xf32>
    %cst_130 = arith.constant 0.000000e+00 : f32
    %125 = vector.broadcast %cst_130 : f32 to vector<2x2xf32>
    %126 = arith.maximumf %124, %125 : vector<2x2xf32>
    %c0_131 = arith.constant 0 : index
    %c0_132 = arith.constant 0 : index
    %127 = vector.load %arg11[%c0_131, %c0_132] : memref<32x2xf32, #tpu.memory_space<vmem>>, vector<32x2xf32>
    %cst_133 = arith.constant dense<0.000000e+00> : vector<32x2xf32>
    %128 = tpu.matmul %127, %126, %cst_133 {dimension_numbers = #tpu.dot_dimension_numbers<[1], [0], [0], [1], [0, 0, 1, 1], [], []>} : vector<32x2xf32>, vector<2x2xf32>, vector<32x2xf32> -> vector<32x2xf32>
    %129 = arith.negf %128 : vector<32x2xf32>
    %130 = math.exp %129 : vector<32x2xf32>
    %cst_134 = arith.constant 1.000000e+00 : f32
    %131 = vector.broadcast %cst_134 : f32 to vector<32x2xf32>
    %132 = arith.addf %131, %130 : vector<32x2xf32>
    %133 = arith.divf %131, %132 : vector<32x2xf32>
    %134 = arith.truncf %133 : vector<32x2xf32> to vector<32x2xbf16>
    %c0_135 = arith.constant 0 : index
    %c0_136 = arith.constant 0 : index
    %135 = vector.load %arg5[%c0_135, %c0_136] : memref<2x128xbf16, #tpu.memory_space<vmem>>, vector<2x128xbf16>
    %cst_137 = arith.constant dense<0.000000e+00> : vector<32x128xf32>
    %136 = tpu.matmul %134, %135, %cst_137 {dimension_numbers = #tpu.dot_dimension_numbers<[1], [0], [0], [1], [0, 0, 1, 1], [], []>} : vector<32x2xbf16>, vector<2x128xbf16>, vector<32x128xf32> -> vector<32x128xf32>
    %137 = arith.mulf %117, %136 : vector<32x128xf32>
    %c0_138 = arith.constant 0 : index
    %c0_139 = arith.constant 0 : index
    %138 = vector.load %arg12[%c0_138, %c0_139] : memref<32x4xbf16, #tpu.memory_space<vmem>>, vector<32x4xbf16>
    %c0_140 = arith.constant 0 : index
    %c0_141 = arith.constant 0 : index
    %c0_142 = arith.constant 0 : index
    %139 = vector.load %arg2[%c0_140, %c0_141, %c0_142] : memref<1x4x128xbf16, #tpu.memory_space<vmem>>, vector<1x4x128xbf16>
    %140 = vector.shape_cast %139 : vector<1x4x128xbf16> to vector<4x128xbf16>
    %cst_143 = arith.constant dense<0.000000e+00> : vector<32x128xf32>
    %141 = tpu.matmul %138, %140, %cst_143 {dimension_numbers = #tpu.dot_dimension_numbers<[1], [0], [0], [1], [0, 0, 1, 1], [], []>} : vector<32x4xbf16>, vector<4x128xbf16>, vector<32x128xf32> -> vector<32x128xf32>
    %c0_144 = arith.constant 0 : index
    %c0_145 = arith.constant 0 : index
    %142 = vector.load %arg13[%c0_144, %c0_145] : memref<32x1xf32, #tpu.memory_space<vmem>>, vector<32x1xf32>
    %143 = vector.broadcast %142 : vector<32x1xf32> to vector<32x128xf32>
    %144 = arith.addf %141, %143 : vector<32x128xf32>
    %145 = arith.addf %137, %144 : vector<32x128xf32>
    %cst_146 = arith.constant 0.000000e+00 : f32
    %146 = vector.broadcast %cst_146 : f32 to vector<32x128xf32>
    %147 = arith.maximumf %145, %146 : vector<32x128xf32>
    %c0_147 = arith.constant 0 : index
    %c0_148 = arith.constant 0 : index
    %c0_149 = arith.constant 0 : index
    %148 = vector.load %arg14[%c0_147, %c0_148, %c0_149] : memref<1x32x128xf32, #tpu.memory_space<vmem>>, vector<1x32x128xf32>
    %149 = vector.shape_cast %148 : vector<1x32x128xf32> to vector<32x128xf32>
    %150 = vector.shape_cast %147 : vector<32x128xf32> to vector<1x32x128xf32>
    tpu.vector_store %arg14[%c0_147, %c0_148, %c0_149], %150 {strides = array<i32>} : memref<1x32x128xf32, #tpu.memory_space<vmem>>, vector<1x32x128xf32>,
    return
  }
  func.func @transform_0(%arg0: i32) -> (i32, i32, i32, i32) {
    %c0_i32 = arith.constant 0 : i32
    %c0_i32_0 = arith.constant 0 : i32
    %c0_i32_1 = arith.constant 0 : i32
    %c0_i32_2 = arith.constant 0 : i32
    return %arg0, %c0_i32, %c0_i32_0, %c0_i32_1 : i32, i32, i32, i32
  }
  func.func @transform_1(%arg0: i32) -> (i32, i32, i32) {
    %c0_i32 = arith.constant 0 : i32
    %c0_i32_0 = arith.constant 0 : i32
    %c0_i32_1 = arith.constant 0 : i32
    return %arg0, %c0_i32, %c0_i32_0 : i32, i32, i32
  }
  func.func @transform_2(%arg0: i32) -> (i32, i32) {
    %c0_i32 = arith.constant 0 : i32
    %c0_i32_0 = arith.constant 0 : i32
    %c0_i32_1 = arith.constant 0 : i32
    return %c0_i32, %c0_i32_0 : i32, i32
  }
  func.func @transform_3(%arg0: i32) -> (i32, i32) {
    %c0_i32 = arith.constant 0 : i32
    %c0_i32_0 = arith.constant 0 : i32
    %c0_i32_1 = arith.constant 0 : i32
    return %c0_i32, %c0_i32_0 : i32, i32
  }
  func.func @transform_4(%arg0: i32) -> (i32, i32) {
    %c0_i32 = arith.constant 0 : i32
    %c0_i32_0 = arith.constant 0 : i32
    %c0_i32_1 = arith.constant 0 : i32
    return %c0_i32, %c0_i32_0 : i32, i32
  }
  func.func @transform_5(%arg0: i32) -> (i32, i32, i32) {
    %c0_i32 = arith.constant 0 : i32
    %c0_i32_0 = arith.constant 0 : i32
    %c0_i32_1 = arith.constant 0 : i32
    %c0_i32_2 = arith.constant 0 : i32
    return %c0_i32, %c0_i32_0, %c0_i32_1 : i32, i32, i32
  }
  func.func @transform_6(%arg0: i32) -> (i32, i32) {
    %c0_i32 = arith.constant 0 : i32
    %c0_i32_0 = arith.constant 0 : i32
    %c0_i32_1 = arith.constant 0 : i32
    return %c0_i32, %c0_i32_0 : i32, i32
  }
  func.func @transform_7(%arg0: i32) -> (i32, i32, i32) {
    %c0_i32 = arith.constant 0 : i32
    %c0_i32_0 = arith.constant 0 : i32
    %c0_i32_1 = arith.constant 0 : i32
    %c0_i32_2 = arith.constant 0 : i32
    return %c0_i32, %c0_i32_0, %c0_i32_1 : i32, i32, i32
  }
  func.func @transform_8(%arg0: i32) -> (i32, i32) {
    %c0_i32 = arith.constant 0 : i32
    %c0_i32_0 = arith.constant 0 : i32
    %c0_i32_1 = arith.constant 0 : i32
    return %c0_i32, %c0_i32_0 : i32, i32
  }
  func.func @transform_9(%arg0: i32) -> (i32, i32) {
    %c0_i32 = arith.constant 0 : i32
    %c0_i32_0 = arith.constant 0 : i32
    %c0_i32_1 = arith.constant 0 : i32
    return %c0_i32, %c0_i32_0 : i32, i32
  }
  func.func @transform_10(%arg0: i32) -> (i32, i32) {
    %c0_i32 = arith.constant 0 : i32
    %c0_i32_0 = arith.constant 0 : i32
    %c0_i32_1 = arith.constant 0 : i32
    return %c0_i32, %c0_i32_0 : i32, i32
  }
  func.func @transform_11(%arg0: i32) -> (i32, i32) {
    %c0_i32 = arith.constant 0 : i32
    %c0_i32_0 = arith.constant 0 : i32
    %c0_i32_1 = arith.constant 0 : i32
    return %c0_i32, %c0_i32_0 : i32, i32
  }
  func.func @transform_12(%arg0: i32) -> (i32, i32) {
    %c0_i32 = arith.constant 0 : i32
    %c0_i32_0 = arith.constant 0 : i32
    %c0_i32_1 = arith.constant 0 : i32
    return %c0_i32, %c0_i32_0 : i32, i32
  }
  func.func @transform_13(%arg0: i32) -> (i32, i32, i32) {
    %c0_i32 = arith.constant 0 : i32
    %c0_i32_0 = arith.constant 0 : i32
    %c0_i32_1 = arith.constant 0 : i32
    return %arg0, %c0_i32, %c0_i32_0 : i32, i32, i32
  }
}

</mosaic_0001>

<bundles_post_ra>
// kernel: tpu_custom_call.1
= control target key start
LH: loop header
LB: loop body
LE: loop exit
PB: predicated region body
PF: predicated region fallthrough
CT: control target
= control target key end

     0   :  { %s3972_s0 = inlined_call_operand.vmem [shape: bf16[2,2,4,136], index: 0, kind: input, shape index: {}]   ;;  %s3973_s1 = inlined_call_operand.vmem [shape: bf16[2,4,128], index: 1, kind: input, shape index: {}]   ;;  %s3974_s2 = inlined_call_operand.vmem [shape: f32[1,128], index: 2, kind: input, shape index: {}]   ;;  %s3975_s3 = inlined_call_operand.vmem [shape: bf16[128,2], index: 3, kind: input, shape index: {}]   ;;  %s3976_s4 = inlined_call_operand.vmem [shape: bf16[2,128], index: 4, kind: input, shape index: {}]   ;;  %s3977_s5 = inlined_call_operand.vmem [shape: bf16[9,32,4], index: 5, kind: input, shape index: {}]   ;;  %s3978_s6 = inlined_call_operand.vmem [shape: f32[32,1], index: 6, kind: input, shape index: {}]   ;;  %s3979_s7 = inlined_call_operand.vmem [shape: bf16[9,32,32], index: 7, kind: input, shape index: {}]   ;;  %s3980_s8 = inlined_call_operand.vmem [shape: f32[32,1], index: 8, kind: input, shape index: {}]   ;;  %s3981_s9 = inlined_call_operand.vmem [shape: f32[2,32], index: 9, kind: input, shape index: {}]   ;;  %s3982_s10 = inlined_call_operand.vmem [shape: f32[32,2], index: 10, kind: input, shape index: {}]   ;;  %s3983_s11 = inlined_call_operand.vmem [shape: bf16[32,4], index: 11, kind: input, shape index: {}]   ;;  %s3984_s12 = inlined_call_operand.vmem [shape: f32[32,1], index: 12, kind: input, shape index: {}]   ;;  %s3985_s13 = inlined_call_operand.hbm [shape: f32[2,32,128], index: 13, kind: output, shape index: {}]  }
   0x1   :  { %3995 = sst [smem:[#allocation8_spill]] %s3972_s0 }
   0x2   :  { %3996 = sst [smem:[#allocation9_spill]] %s3974_s2 }
   0x3   :  { %18 = vsyncpa [#allocation4], 0 }
   0x4   :  { %20 = vsyncpa [#allocation4 + $0x1], 0  ;;  %s3512_s25 = smov 0   ;;  %s3514_s26 = smov 0  }
   0x5   :  { %s3516_s27 = smov 0   ;;  %s3518_s28 = smov 0  }
   0x6 LB: > { %3997 = sst [smem:[#allocation6_spill]] %s3422_s27  ;;  %s3533_s29 = sadd.s32 4294967295, %s3426_s28   ;;  %s3426_s28 = sphi %s3518_s28, %s4011_s28   ;;  %s3422_s27 = sphi %s3516_s27, %s4008_s27   ;;  %s3418_s26 = sphi %s3514_s26, %s4010_s26   ;;  %s3414_s25 = sphi %s3512_s25, %s4009_s25  }
   0x7   : > { %s2756_s30 = sadd.s32 4294967294, %s3426_s28   ;;  %s3537_s14 = sadd.s32 1, %s3426_s28  }
   0x8   : > { %s316_s15 = sadd.s32 1, %s3422_s27  ;;  %s313_s16 = ssub.s32 %s3426_s28, %s3537_s14 }
   0x9   : > { %p326_p0 = scmp.ne.s32.totalorder %s3422_s27, %s3418_s26  ;;  %p314_p1 = scmp.eq.s32.totalorder %s313_s16, 0 }
   0xa   : > { %p327_p2 = scmp.eq.s32.totalorder %s3533_s29, 1  ;;  %p332_p3 = scmp.ne.s32.totalorder %s3418_s26, %s3414_s25 }
   0xb   : > { %p333_p4 = scmp.eq.s32.totalorder %s2756_s30, 1  ;;  %p2759_p7 = scmp.ge.s32.totalorder %s3426_s28, 1 }
   0xc   : > { %s3548_s17 = scalar_select %p314_p1, %s3422_s27, %s316_s15  }
   0xd   : > { %p3550_p5 = por %p327_p2, %p326_p0  ;;  %p3554_p6 = por %p333_p4, %p332_p3 }
   0xe   : > { %3998 = sst [smem:[#allocation7_spill]] %s3548_s17  ;;  %p399_p8 = scmp.lt.s32.totalorder %s3426_s28, 3 }
  0x10   : > { %p400_p9 = pnand %p2759_p7, %p399_p8 }
  0x11   : > { %p447_p10 = scmp.lt.s32.totalorder (!%p400_p9), %s3533_s29, 1  ;;  %s4001_s0 = sld [smem:[#allocation8_spill]] (!%p400_p9) }
  0x12   : > { %403 = sbr.rel (%p400_p9) target bundleno = 1643 (0x66b), region = 72  ;;  %s3991_s22 = smov (!%p400_p9), 127  }
  0x13   : > { %s3989_s27 = smov (!%p400_p9), 126   ;;  %s3987_s20 = smov (!%p400_p9), 125  }
  0x14   : > { %s4002_s2 = sld [smem:[#allocation9_spill]] (!%p400_p9)  ;;  %s3435_s23 = smov (!%p400_p9), 2  }
  0x15   : > { %s3436_s15 = smov (!%p400_p9), 1   ;;  %s4004_s21 = smov (!%p400_p9), 126  }
  0x16   : > { %s4006_s16 = smov (!%p400_p9), 124  }
  0x17   : > { %v3292_v0 = vld [vmem:[%s3977_s5 + $0x10] sm:$0xff]   ;;  %vm479_vm0 = vcmask 31744   ;;  %v3293_v1 = vld [vmem:[%s3977_s5] sm:$0xff]   ;;  %s3568_s24 = scalar_select %p447_p10, %s3533_s29, 1  ;;  %vm486_vm1 = vcmask 1041408   ;;  %v3294_v4 = vld [vmem:[%s3977_s5 + $0x18] sm:$0xff]  }
  0x18   : > { %3052 = vmatprep.mubr.msk.bf16.mxu0 %vm479_vm0, %v3292_v0  ;;  %3058 = vmatprep.mubr.msk.bf16.mxu1 %vm479_vm0, %v3293_v1  ;;  %v3295_v8 = vld [vmem:[%s3977_s5 + $0x8] sm:$0xff]   ;;  %v3296_v12 = vld [vmem:[%s3977_s5 + $0x20] sm:$0xff]   ;;  %v3298_v13 = vld [vmem:[%s3977_s5 + $0x30] sm:$0xff]   ;;  %v3431_v14 = vmov 0   ;;  %vm636_vm2 = vcmask 1039360   ;;  %vm821_vm3 = vcmask 1031168  }
  0x19   : > { %s2955_s30 = sshll.u32 %s3568_s24, 3  ;;  %3291 = vset.pattern.permute.xlu1 %v3431_v14  ;;  %3290 = vset.pattern.permute.xlu0 %v3431_v14  ;;  %v1258_v15 = vld [vmem:[%s3978_s6 + $0x18] sm:$0xff]  ;;  %v1257_v16 = vld [vmem:[%s3978_s6 + $0x10] sm:$0xff]  ;;  %v1255_v17 = vld [vmem:[%s3978_s6] sm:$0xff]  ;;  %vm1006_vm4 = vcmask 1022976   ;;  %vm1191_vm5 = vcmask 1014784  }
  0x1a   : > { %s451_s17 = scalar_lea.vmem %s4001_s0, %s2955_s30  ;;  %s3993_s30 = smov 124   ;;  %v1256_v18 = vld [vmem:[%s3978_s6 + $0x8] sm:$0xff]  ;;  %v3299_v26 = vld [vmem:[%s3977_s5 + $0x38] sm:$0xff]   ;;  %v3300_v30 = vld [vmem:[%s3977_s5 + $0x40] sm:$0xff]   ;;  %vm1298_vm6 = vcmask 1044448   ;;  %vm1303_vm7 = vcmask 27648  }
  0x1b   : > { %v2793_v2 = vld.sshfl [vmem:[%s451_s17 + $0x4] sm:$0x33 pattern:$0x76325410]  ;;  %v457_v7 = vld [vmem:[%s451_s17] sm:$0x3] }
  0x1c   : > { %v2764_v3 = vld [vmem:[%s451_s17 + $0x4] sm:$0x3]  ;;  %725 = vrot.lane.b32.xlu1 %v2793_v2, %s3991_s22  ;;  %v724_v5 = vcombine.high %v2793_v2, %v2793_v2  ;;  %v2783_v6 = vld.sshfl [vmem:[%s451_s17] sm:$0x33 pattern:$0x76325410]  ;;  %3228 = vmatprep.subr.msk.bf16.mxu1 %vm486_vm1, %v457_v7 }
  0x1d   : > { %3227 = vmatprep.subr.msk.bf16.mxu0 %vm486_vm1, %v2764_v3  ;;  %632 = vrot.lane.b32.xlu0 %v2783_v6, %s3991_s22  ;;  %v631_v9 = vcombine.high %v2783_v6, %v2783_v6  ;;  %v488_v10 = vsel %vm486_vm1, %v2764_v3, 0  ;;  %v556_v11 = vsel %vm486_vm1, %v457_v7, 0  ;;  %v3297_v28 = vld [vmem:[%s3977_s5 + $0x28] sm:$0xff]   ;;  %v3302_v32 = vld [vmem:[%s3977_s5 + $0x50] sm:$0xff]   ;;  %v3303_v40 = vld [vmem:[%s3977_s5 + $0x58] sm:$0xff]   ;;  %s4003_s17 = smov 127  }
  0x1e   : > { %3051 = vmatpush3.bf16.msra.mxu0 %v488_v10  ;;  %3057 = vmatpush3.bf16.msra.mxu1 %v556_v11  ;;  %v3301_v39 = vld [vmem:[%s3977_s5 + $0x48] sm:$0xff]   ;;  %v3304_v42 = vld [vmem:[%s3977_s5 + $0x60] sm:$0xff]   ;;  %v3306_v44 = vld [vmem:[%s3977_s5 + $0x70] sm:$0xff]   ;;  %1301 = vst.msk [vmem:[#allocation2 + $0x18] sm:$0xf] %vm1298_vm6, %v3431_v14  ;;  %vm1380_vm8 = vcmask 261120  }
  0x1f   : > { %v3305_v51 = vld [vmem:[%s3977_s5 + $0x68] sm:$0xff]   ;;  %v3307_v52 = vld [vmem:[%s3977_s5 + $0x78] sm:$0xff]   ;;  %v3308_v54 = vld [vmem:[%s3977_s5 + $0x80] sm:$0xff]   ;;  %1302 = vst.msk [vmem:[#allocation2 + $0x24] sm:$0xf] %vm1298_vm6, %v3431_v14  ;;  %vm1375_vm9 = vcmask 23552  }
  0x20   : > { %727 = vrot.lane.b32.xlu1 %v724_v5, %s3991_s22  ;;  %v3309_v58 = vld [vmem:[%s3977_s5 + $0x88] sm:$0xff]   ;;  %1299 = vst.msk [vmem:[#allocation2] sm:$0xf] %vm1298_vm6, %v3431_v14  ;;  %1300 = vst.msk [vmem:[#allocation2 + $0xc] sm:$0xf] %vm1298_vm6, %v3431_v14  ;;  %vm1537_vm10 = vcmask 15360  }
  0x21   : > { %634 = vrot.lane.b32.xlu0 %v631_v9, %s3991_s22  ;;  %3053 = vmatmul.mubr.msk.bf16.vlgmr.msra.gmra.mxu0 %vm479_vm0, %v3294_v4  ;;  %1306 = vst.msk [vmem:[#allocation2 + $0x20] sm:$0xf] %vm1303_vm7, %v3431_v14  ;;  %1307 = vst.msk [vmem:[#allocation2 + $0x2c] sm:$0xf] %vm1303_vm7, %v3431_v14  ;;  %s3433_s22 = smov 3   ;;  %vm1624_vm11 = vcmask 7168  }
  0x22   : > { %3059 = vmatmul.mubr.msk.bf16.vlgmr.msra.gmra.mxu1 %vm479_vm0, %v3295_v8  ;;  %3064 = vmatprep.mubr.msk.bf16.mxu0 %vm479_vm0, %v3296_v12  ;;  %1304 = vst.msk [vmem:[#allocation2 + $0x8] sm:$0xf] %vm1303_vm7, %v3431_v14  ;;  %1305 = vst.msk [vmem:[#allocation2 + $0x14] sm:$0xf] %vm1303_vm7, %v3431_v14  ;;  %vm3438_vm12 = vmmov 0   ;;  %vm2502_vm13 = vcmask 1040384  }
  0x23   : > { %3070 = vmatprep.mubr.msk.bf16.mxu1 %vm479_vm0, %v3298_v13 }
  0x24   : > { %819 = vrot.lane.b32.xlu1 %v631_v9, %s3989_s27 }
  0x25   : > { %817 = vrot.lane.b32.xlu0 %v2783_v6, %s3989_s27 }
  0x28   : > { %912 = vrot.lane.b32.xlu1 %v724_v5, %s3989_s27 }
  0x29   : > { %910 = vrot.lane.b32.xlu0 %v2793_v2, %s3989_s27  ;;  %s3434_s27 = smov 4  }
  0x2c   : > { %1004 = vrot.lane.b32.xlu1 %v631_v9, %s3987_s20 }
  0x2d   : > { %1002 = vrot.lane.b32.xlu0 %v2783_v6, %s3987_s20 }
  0x30   : > { %1097 = vrot.lane.b32.xlu1 %v724_v5, %s3987_s20 }
  0x31   : > { %1095 = vrot.lane.b32.xlu0 %v2793_v2, %s3987_s20 }
  0x34   : > { %1189 = vrot.lane.b32.xlu1 %v631_v9, %s3993_s30 }
  0x35   : > { %1187 = vrot.lane.b32.xlu0 %v2783_v6, %s3993_s30 }
  0x38   : > { %1276 = vperm.xlu1 %3291, %v1258_v15  }
  0x39   : > { %1271 = vperm.xlu0 %3290, %v1257_v16  }
  0x3c   : > { %1261 = vperm.xlu1 %3291, %v1255_v17  }
  0x3d   : > { %1266 = vperm.xlu0 %3290, %v1256_v18  }
  0x8e   : > { %v726_v19 = vpop.permute.xlu1 %725 }
  0x8f   : > { %v633_v20 = vpop.permute.xlu0 %632 }
  0x92   : > { %v728_v21 = vpop.permute.xlu1 %727 }
  0x93   : > { %v729_v22 = vsel %vm636_vm2, %v726_v19, %v728_v21  ;;  %v635_v23 = vpop.permute.xlu0 %634 }
  0x94   : > { %v737_v24 = vsel %vm486_vm1, %v729_v22, 0  ;;  %v637_v25 = vsel %vm636_vm2, %v633_v20, %v635_v23  ;;  %3230 = vmatprep.subr.msk.bf16.mxu1 %vm486_vm1, %v729_v22 }
  0x95   : > { %v645_v27 = vsel %vm486_vm1, %v637_v25, 0  ;;  %3229 = vmatprep.subr.msk.bf16.mxu0 %vm486_vm1, %v637_v25  ;;  %3069 = vmatpush3.bf16.msra.mxu1 %v737_v24 }
  0x96   : > { %3063 = vmatpush3.bf16.msra.mxu0 %v645_v27  ;;  %v820_v29 = vpop.permute.xlu1 %819 }
  0x97   : > { %v818_v31 = vpop.permute.xlu0 %817 }
  0x98   : > { %v822_v33 = vsel %vm821_vm3, %v818_v31, %v820_v29  ;;  %3071 = vmatmul.mubr.msk.bf16.vlgmr.msra.gmra.mxu1 %vm479_vm0, %v3299_v26 }
  0x99   : > { %v830_v34 = vsel %vm486_vm1, %v822_v33, 0  ;;  %3065 = vmatmul.mubr.msk.bf16.vlgmr.msra.gmra.mxu0 %vm479_vm0, %v3297_v28  ;;  %3231 = vmatprep.subr.msk.bf16.mxu0 %vm486_vm1, %v822_v33 }
  0x9a   : > { %v913_v35 = vpop.permute.xlu1 %912  ;;  %3075 = vmatpush3.bf16.msra.mxu0 %v830_v34  ;;  %3076 = vmatprep.mubr.msk.bf16.mxu0 %vm479_vm0, %v3300_v30 }
  0x9b   : > { %v911_v36 = vpop.permute.xlu0 %910  ;;  %3082 = vmatprep.mubr.msk.bf16.mxu1 %vm479_vm0, %v3302_v32 }
  0x9c   : > { %v914_v37 = vsel %vm821_vm3, %v911_v36, %v913_v35 }
  0x9d   : > { %v922_v38 = vsel %vm486_vm1, %v914_v37, 0  ;;  %3232 = vmatprep.subr.msk.bf16.mxu1 %vm486_vm1, %v914_v37 }
  0x9e   : > { %3081 = vmatpush3.bf16.msra.mxu1 %v922_v38  ;;  %v1005_v41 = vpop.permute.xlu1 %1004 }
  0x9f   : > { %v1003_v43 = vpop.permute.xlu0 %1002 }
  0xa0   : > { %v1007_v45 = vsel %vm1006_vm4, %v1003_v43, %v1005_v41 }
  0xa1   : > { %v1015_v46 = vsel %vm486_vm1, %v1007_v45, 0  ;;  %3077 = vmatmul.mubr.msk.bf16.vlgmr.msra.gmra.mxu0 %vm479_vm0, %v3301_v39  ;;  %3083 = vmatmul.mubr.msk.bf16.vlgmr.msra.gmra.mxu1 %vm479_vm0, %v3303_v40 }
  0xa2   : > { %v1098_v47 = vpop.permute.xlu1 %1097  ;;  %3233 = vmatprep.subr.msk.bf16.mxu0 %vm486_vm1, %v1007_v45  ;;  %3088 = vmatprep.mubr.msk.bf16.mxu0 %vm479_vm0, %v3304_v42 }
  0xa3   : > { %v1096_v48 = vpop.permute.xlu0 %1095  ;;  %3087 = vmatpush3.bf16.msra.mxu0 %v1015_v46  ;;  %3094 = vmatprep.mubr.msk.bf16.mxu1 %vm479_vm0, %v3306_v44 }
  0xa4   : > { %v1099_v49 = vsel %vm1006_vm4, %v1096_v48, %v1098_v47 }
  0xa5   : > { %v1107_v50 = vsel %vm486_vm1, %v1099_v49, 0  ;;  %3234 = vmatprep.subr.msk.bf16.mxu1 %vm486_vm1, %v1099_v49 }
  0xa6   : > { %3093 = vmatpush3.bf16.msra.mxu1 %v1107_v50  ;;  %v1190_v53 = vpop.permute.xlu1 %1189 }
  0xa7   : > { %v1188_v55 = vpop.permute.xlu0 %1187 }
  0xa8   : > { %v1192_v56 = vsel %vm1191_vm5, %v1188_v55, %v1190_v53 }
  0xa9   : > { %3089 = vmatmul.mubr.msk.bf16.vlgmr.msra.gmra.mxu0 %vm479_vm0, %v3305_v51  ;;  %v1200_v57 = vsel %vm486_vm1, %v1192_v56, 0  ;;  %3095 = vmatmul.mubr.msk.bf16.vlgmr.msra.gmra.mxu1 %vm479_vm0, %v3307_v52 }
  0xaa   : > { %3235 = vmatprep.subr.msk.bf16.mxu0 %vm486_vm1, %v1192_v56  ;;  %3100 = vmatprep.mubr.msk.bf16.mxu0 %vm479_vm0, %v3308_v54 }
  0xab   : > { %3099 = vmatpush3.bf16.msra.mxu0 %v1200_v57 }
  0xb1   : > { %3101 = vmatmul.mubr.msk.bf16.vlgmr.msra.gmra.mxu0 %vm479_vm0, %v3309_v58 }
  0xb3   : > { %v1277_v41 = vpop.permute.xlu1 %1276 }
  0xb4   : > { %v1272_v50 = vpop.permute.xlu0 %1271 }
  0xb7   : > { %v1262_v57 = vpop.permute.xlu1 %1261 }
  0xe1   : > { %v3054_v60 = vpop.f32.mrf.mxu0 }
  0xe2   : > { %v3060_v59 = vpop.f32.mrf.mxu1 }
  0xe3   : > { %v524_v62 = vpop.f32.mrf.mxu0  ;;  %v601_v9 = vadd.f32 %v3060_v59, %v3054_v60 }
  0xe4   : > { %v592_v61 = vpop.f32.mrf.mxu1 }
  0xe5   : > { %v3055_v0 = vpop.f32.mrf.mxu0  ;;  %v593_v12 = vadd.f32 %v592_v61, %v524_v62  ;;  %v2843_v62 = vld [vmem:[%s4002_s2] ss:$0 sm:$0xff]  ;;  %s4005_s2 = smov 125  }
  0xe6   : > { %v3061_v63 = vpop.f32.mrf.mxu1 }
  0xe7   : > { %v527_v2 = vpop.f32.mrf.mxu0  ;;  %v604_v16 = vadd.f32 %v3061_v63, %v3055_v0 }
  0xe8   : > { %v595_v1 = vpop.f32.mrf.mxu1 }
  0xe9   : > { %v596_v20 = vadd.f32 %v595_v1, %v527_v2 }
 0x158   : > { %v3072_v3 = vpop.f32.mrf.mxu1 }
 0x159   : > { %v3066_v4 = vpop.f32.mrf.mxu0 }
 0x15a   : > { %v773_v5 = vpop.f32.mrf.mxu1  ;;  %v698_v13 = vadd.f32 %v3066_v4, %v601_v9  ;;  %v1267_v9 = vpop.permute.xlu0 %1266 }
 0x15b   : > { %v681_v6 = vpop.f32.mrf.mxu0 }
 0x15c   : > { %v3073_v7 = vpop.f32.mrf.mxu1  ;;  %v696_v17 = vadd.f32 %v681_v6, %v593_v12  ;;  %v790_v21 = vadd.f32 %v3072_v3, %v698_v13 }
 0x15d   : > { %v3067_v8 = vpop.f32.mrf.mxu0 }
 0x15e   : > { %v776_v10 = vpop.f32.mrf.mxu1  ;;  %v699_v22 = vadd.f32 %v3067_v8, %v604_v16  ;;  %v788_v25 = vadd.f32 %v773_v5, %v696_v17 }
 0x15f   : > { %v684_v11 = vpop.f32.mrf.mxu0 }
 0x160   : > { %v697_v26 = vadd.f32 %v684_v11, %v596_v20  ;;  %v791_v30 = vadd.f32 %v3073_v7, %v699_v22 }
 0x161   : > { %v3078_v14 = vpop.f32.mrf.mxu0  ;;  %v3084_v15 = vpop.f32.mrf.mxu1 }
 0x162   : > { %v883_v27 = vadd.f32 %v3078_v14, %v790_v21  ;;  %v789_v34 = vadd.f32 %v776_v10, %v697_v26  ;;  %v3312_v26 = vld [vmem:[#allocation2 + $0x20] ss:$12 sps:$4 sm:$0xff]  }
 0x163   : > { %v866_v18 = vpop.f32.mrf.mxu0  ;;  %v958_v19 = vpop.f32.mrf.mxu1 }
 0x164   : > { %v881_v31 = vadd.f32 %v866_v18, %v788_v25  ;;  %v975_v35 = vadd.f32 %v3084_v15, %v883_v27 }
 0x165   : > { %v3079_v23 = vpop.f32.mrf.mxu0  ;;  %v3085_v24 = vpop.f32.mrf.mxu1 }
 0x166   : > { %v884_v36 = vadd.f32 %v3079_v23, %v791_v30  ;;  %v973_v38 = vadd.f32 %v958_v19, %v881_v31  ;;  %v3316_v31 = vld [vmem:[#allocation2] ss:$12 sps:$4 sm:$0xff]  }
 0x167   : > { %v869_v28 = vpop.f32.mrf.mxu0  ;;  %v961_v29 = vpop.f32.mrf.mxu1 }
 0x168   : > { %v882_v39 = vadd.f32 %v869_v28, %v789_v34  ;;  %v976_v44 = vadd.f32 %v3085_v24, %v884_v36  ;;  %v3320_v28 = vld [vmem:[%s3979_s7 + $0x10] sm:$0xff]   ;;  %v2143_v34 = vld [vmem:[%s3980_s8 + $0x8] sm:$0xff]  ;;  %v2145_v36 = vld [vmem:[%s3980_s8 + $0x18] sm:$0xff] }
 0x169   : > { %v3090_v32 = vpop.f32.mrf.mxu0  ;;  %v3096_v33 = vpop.f32.mrf.mxu1  ;;  %3108 = vmatprep.mubr.msk.bf16.mxu1 %vm1380_vm8, %v3320_v28 }
 0x16a   : > { %v1068_v40 = vadd.f32 %v3090_v32, %v975_v35  ;;  %v974_v47 = vadd.f32 %v961_v29, %v882_v39  ;;  %v3322_v29 = vld [vmem:[%s3979_s7] sm:$0xff]   ;;  %v3317_v32 = vld [vmem:[#allocation2 + $0x8] ss:$12 sps:$4 sm:$0xff]  }
 0x16b   : > { %v1051_v37 = vpop.f32.mrf.mxu0  ;;  %v1143_v43 = vpop.f32.mrf.mxu1  ;;  %3116 = vmatprep.mubr.msk.bf16.mxu0 %vm1380_vm8, %v3322_v29  ;;  %v2142_v35 = vld [vmem:[%s3980_s8] sm:$0xff] }
 0x16c   : > { %v1066_v45 = vadd.f32 %v1051_v37, %v973_v38  ;;  %v1160_v48 = vadd.f32 %v3096_v33, %v1068_v40  ;;  %v2144_v37 = vld [vmem:[%s3980_s8 + $0x10] sm:$0xff]  ;;  %v2565_v38 = vld [vmem:[%s3984_s12 + $0x8] sm:$0xff]  ;;  %v2564_v39 = vld [vmem:[%s3984_s12] sm:$0xff] }
 0x16d   : > { %v3091_v42 = vpop.f32.mrf.mxu0  ;;  %v3097_v51 = vpop.f32.mrf.mxu1  ;;  %v2567_v40 = vld [vmem:[%s3984_s12 + $0x18] sm:$0xff] }
 0x16e   : > { %v1069_v49 = vadd.f32 %v3091_v42, %v976_v44  ;;  %v1158_v53 = vadd.f32 %v1143_v43, %v1066_v45 }
 0x16f   : > { %v1054_v46 = vpop.f32.mrf.mxu0  ;;  %v1146_v61 = vpop.f32.mrf.mxu1 }
 0x170   : > { %v1067_v54 = vadd.f32 %v1054_v46, %v974_v47  ;;  %v1161_v58 = vadd.f32 %v3097_v51, %v1069_v49 }
 0x171   : > { %v3102_v52 = vpop.f32.mrf.mxu0 }
 0x172   : > { %v1253_v55 = vadd.f32 %v3102_v52, %v1160_v48  ;;  %v1159_v0 = vadd.f32 %v1146_v61, %v1067_v54  ;;  %v3321_v61 = vld [vmem:[%s3979_s7 + $0x18] sm:$0xff]  }
 0x173   : > { %v1236_v56 = vpop.f32.mrf.mxu0 }
 0x174   : > { %v1281_v59 = vadd.f32 %v1272_v50, %v1253_v55  ;;  %v1251_v60 = vadd.f32 %v1236_v56, %v1158_v53 }
 0x175   : > { %v3103_v63 = vpop.f32.mrf.mxu0 }
 0x176   : > { %v1285_v1 = vmax.f32 %v1281_v59, 0.0  ;;  %v1279_v2 = vadd.f32 %v1262_v57, %v1251_v60  ;;  %v1254_v3 = vadd.f32 %v3103_v63, %v1161_v58 }
 0x177   : > { %v1239_v4 = vpop.f32.mrf.mxu0 }
 0x178   : > { %v1296_v5 = vmul.f32 %v2843_v62, %v1285_v1  ;;  %v1283_v6 = vmax.f32 %v1279_v2, 0.0  ;;  %v1282_v7 = vadd.f32 %v1277_v41, %v1254_v3  ;;  %v1252_v8 = vadd.f32 %v1239_v4, %v1159_v0  ;;  %v2566_v41 = vld [vmem:[%s3984_s12 + $0x10] sm:$0xff]  ;;  %v3325_v1 = vld [vmem:[%s3979_s7 + $0x20] sm:$0xff]   ;;  %v3323_v3 = vld [vmem:[%s3979_s7 + $0x8] sm:$0xff]  }
 0x17a   : > { %v2958_v10 = vpack.c.bf16 %v1296_v5, %v1296_v5  ;;  %v1294_v11 = vmul.f32 %v2843_v62, %v1283_v6  ;;  %v1286_v12 = vmax.f32 %v1282_v7, 0.0  ;;  %v1280_v13 = vadd.f32 %v1267_v9, %v1252_v8  ;;  %v3328_v7 = vld [vmem:[%s3979_s7 + $0x30] sm:$0xff]  }
 0x17c   : > { %1326 = vst [vmem:[#allocation2 + $0x1c] sm:$0xf] %v2958_v10  ;;  %v2956_v14 = vpack.c.bf16 %v1294_v11, %v1294_v11  ;;  %v1297_v15 = vmul.f32 %v2843_v62, %v1286_v12  ;;  %v1284_v16 = vmax.f32 %v1280_v13, 0.0  ;;  %v3326_v10 = vld [vmem:[%s3979_s7 + $0x28] sm:$0xff]  }
 0x17e   : > { %1324 = vst [vmem:[#allocation2 + $0x4] sm:$0xf] %v2956_v14  ;;  %v2959_v17 = vpack.c.bf16 %v1297_v15, %v1297_v15  ;;  %v1295_v18 = vmul.f32 %v2843_v62, %v1284_v16  ;;  %v3330_v14 = vld [vmem:[%s3979_s7 + $0x40] sm:$0xff]   ;;  %v3329_v16 = vld [vmem:[%s3979_s7 + $0x38] sm:$0xff]  }
 0x180   : > { %1327 = vst [vmem:[#allocation2 + $0x28] sm:$0xf] %v2959_v17  ;;  %v2957_v19 = vpack.c.bf16 %v1295_v18, %v1295_v18 }
 0x182   : > { %1325 = vst [vmem:[#allocation2 + $0x10] sm:$0xf] %v2957_v19 }
 0x183   : > { %v1334_v20 = vld [vmem:[#allocation2 + $0x18] sm:$0xff] }
 0x184   : > { %v1785_v25 = vld [vmem:[#allocation2 + $0x1c] sm:$0xff] }
 0x187   : > { %v1335_v21 = vld [vmem:[#allocation2 + $0x24] sm:$0xff] }
 0x188   : > { %v3310_v22 = vld [vmem:[#allocation2 + $0x1c] ss:$12 sps:$4 sm:$0xff]   ;;  %v2856_v23 = vcombine.low %v1334_v20, %v1335_v21  ;;  %v3332_v20 = vld [vmem:[%s3979_s7 + $0x50] sm:$0xff]  }
 0x189   : > { %1373 = vrot.lane.b32.xlu0 %v3310_v22, %s3433_s22  ;;  %v1786_v24 = vld [vmem:[#allocation2 + $0x28] sm:$0xff]  ;;  %v3314_v30 = vld [vmem:[#allocation2 + $0x4] ss:$12 sps:$4 sm:$0xff]  }
 0x18a   : > { %1371 = vrot.lane.b32.xlu1 %v2856_v23, %s3433_s22  ;;  %v2898_v27 = vcombine.low %v1785_v25, %v1786_v24  ;;  %v3319_v33 = vld [vmem:[#allocation2 + $0x4] ss:$12 sps:$4 sm:$0xff]   ;;  %v3324_v9 = vld [vmem:[#allocation2 + $0x1c] ss:$12 sps:$4 sm:$0xff]  }
 0x18b   : > { %v3327_v15 = vld [vmem:[#allocation2 + $0x4] ss:$12 sps:$4 sm:$0xff]   ;;  %v3331_v21 = vld [vmem:[%s3979_s7 + $0x48] sm:$0xff]  }
 0x18c   : > { %v3334_v25 = vld [vmem:[%s3979_s7 + $0x60] sm:$0xff]  }
 0x18d   : > { %1452 = vrot.lane.b32.xlu0 %v3310_v22, %s3434_s27 }
 0x18e   : > { %1450 = vrot.lane.b32.xlu1 %v2856_v23, %s3434_s27 }
 0x191   : > { %1535 = vrot.lane.b32.xlu0 %v3310_v22, %s3435_s23 }
 0x192   : > { %1533 = vrot.lane.b32.xlu1 %v2856_v23, %s3435_s23 }
 0x195   : > { %1622 = vrot.lane.b32.xlu0 %v3310_v22, %s3436_s15 }
 0x196   : > { %1620 = vrot.lane.b32.xlu1 %v2856_v23, %s3436_s15 }
 0x199   : > { %1819 = vrot.lane.b32.xlu0 %v3312_v26, %s4003_s17 }
 0x19a   : > { %1817 = vrot.lane.b32.xlu1 %v2898_v27, %s4003_s17 }
 0x19d   : > { %1905 = vrot.lane.b32.xlu0 %v3312_v26, %s4004_s21 }
 0x19e   : > { %1903 = vrot.lane.b32.xlu1 %v2898_v27, %s4004_s21 }
 0x1a1   : > { %1991 = vrot.lane.b32.xlu0 %v3312_v26, %s4005_s2 }
 0x1a2   : > { %1989 = vrot.lane.b32.xlu1 %v2898_v27, %s4005_s2 }
 0x1a5   : > { %1369 = vrot.lane.b32.xlu0 %v3314_v30, %s3433_s22 }
 0x1a6   : > { %1367 = vrot.lane.b32.xlu1 %v3316_v31, %s3433_s22 }
 0x1a9   : > { %1448 = vrot.lane.b32.xlu0 %v3314_v30, %s3434_s27 }
 0x1aa   : > { %1446 = vrot.lane.b32.xlu1 %v3316_v31, %s3434_s27  ;;  %s3439_s27 = smov [#allocation3]  }
 0x1ad   : > { %1531 = vrot.lane.b32.xlu0 %v3314_v30, %s3435_s23 }
 0x1ae   : > { %1529 = vrot.lane.b32.xlu1 %v3316_v31, %s3435_s23  ;;  %s3370_s23 = sshll.u32 %s3439_s27, 4  ;;  %s3371_s23 = int_to_ptr.vmem [resolvable:$false] %s3370_s23 }
 0x1b1   : > { %1618 = vrot.lane.b32.xlu0 %v3314_v30, %s3436_s15 }
 0x1b2   : > { %1616 = vrot.lane.b32.xlu1 %v3316_v31, %s3436_s15  ;;  %v3336_v31 = vld [vmem:[%s3979_s7 + $0x70] sm:$0xff]   ;;  %s3372_s15 = scalar_lea.vmem %s3371_s23, 1024 }
 0x1b5   : > { %2077 = vrot.lane.b32.xlu0 %v3312_v26, %s4006_s16 }
 0x1b6   : > { %2075 = vrot.lane.b32.xlu1 %v2898_v27, %s4006_s16  ;;  %v3333_v27 = vld [vmem:[%s3979_s7 + $0x58] sm:$0xff]  }
 0x1b9   : > { %1815 = vrot.lane.b32.xlu0 %v3317_v32, %s4003_s17 }
 0x1ba   : > { %1813 = vrot.lane.b32.xlu1 %v3319_v33, %s4003_s17  ;;  %s444_s17 = sand.u32 1, %s3418_s26  }
 0x1bd   : > { %1901 = vrot.lane.b32.xlu0 %v3317_v32, %s4004_s21 }
 0x1be   : > { %1899 = vrot.lane.b32.xlu1 %v3319_v33, %s4004_s21 }
 0x1c1   : > { %1987 = vrot.lane.b32.xlu0 %v3317_v32, %s4005_s2 }
 0x1c2   : > { %1985 = vrot.lane.b32.xlu1 %v3319_v33, %s4005_s2  ;;  %s2760_s2 = sshll.u32 %s444_s17, 5 }
 0x1c3   : > { %s446_s20 = scalar_lea.vmem [#allocation3], %s2760_s2 }
 0x1c4   : > { %s2682_s21 = sshll.u32 %s446_s20, 4  ;;  %s3923_s21 = int_to_ptr.vmem [resolvable:$true] %s2682_s21 }
 0x1c5   : > { %2073 = vrot.lane.b32.xlu0 %v3317_v32, %s4006_s16  ;;  %p3373_p0 = scmp.lt.s32.totalorder %s3923_s21, %s3371_s23 }
 0x1c6   : > { %2071 = vrot.lane.b32.xlu1 %v3319_v33, %s4006_s16  ;;  %v3335_v33 = vld [vmem:[%s3979_s7 + $0x68] sm:$0xff]   ;;  %s2763_s16 = sshll.u32 %s3568_s24, 1  ;;  %s3932_s24 = scalar_lea.sflag [#allocation4], %s444_s17 }
 0x1c7   : > { %s455_s22 = scalar_lea.vmem %s3973_s1, %s2763_s16  ;;  %s2960_s16 = sshll.u32 %s3533_s29, 9 }
 0x1c8   : > { %s3366_s29 = scalar_lea.vmem %s3923_s21, 512 }
 0x1c9   : > { %2153 = vperm.xlu0 %3290, %v2143_v34   ;;  %p3367_p11 = scmp.ne.s32.totalorder %s3923_s21, %s3366_s29  ;;  %p3374_p1 = scmp.lt.s32.totalorder %s3372_s15, %s3366_s29 }
 0x1ca   : > { %2148 = vperm.xlu1 %3291, %v2142_v35  }
 0x1cb   : > { %p3368_p12 = pnand %p3367_p11, %p3550_p5  ;;  %p3375_p2 = por %p3374_p1, %p3373_p0 }
 0x1cd   : > { %2163 = vperm.xlu0 %3290, %v2145_v36   ;;  %p3369_p13 = pneg %p3368_p12 }
 0x1ce   : > { %2158 = vperm.xlu1 %3291, %v2144_v37   ;;  %v3338_v37 = vld [vmem:[%s3979_s7 + $0x80] sm:$0xff]  }
 0x1cf   : > { %p3376_p3 = pnand %p3375_p2, %p3369_p13 }
 0x1d1   : > { %2575 = vperm.xlu0 %3290, %v2565_v38  }
 0x1d2   : > { %2570 = vperm.xlu1 %3291, %v2564_v39   ;;  %v3337_v39 = vld [vmem:[%s3979_s7 + $0x78] sm:$0xff]  }
 0x1d5   : > { %2585 = vperm.xlu0 %3290, %v2567_v40  }
 0x1d6   : > { %2580 = vperm.xlu1 %3291, %v2566_v41  }
 0x1fb   : > { %v1374_v42 = vpop.permute.xlu0 %1373 }
 0x1fc   : > { %v1372_v43 = vpop.permute.xlu1 %1371 }
 0x1fd   : > { %v1377_v44 = vsel %vm1375_vm9, %v1372_v43, %v1374_v42  ;;  %v3339_v43 = vld [vmem:[%s3979_s7 + $0x88] sm:$0xff]  }
 0x1fe   : > { %3104 = vmatprep.subr.bf16.mxu1 %v1377_v44 }
 0x1ff   : > { %3105 = vmatpush3.bf16.msra.mxu1 %v1377_v44  ;;  %v1453_v45 = vpop.permute.xlu0 %1452  ;;  %v3340_v44 = vld [vmem:[%s3975_s3 + $0x38] sm:$0xff]  }
 0x200   : > { %v1451_v46 = vpop.permute.xlu1 %1450 }
 0x201   : > { %v1456_v47 = vsel %vm479_vm0, %v1451_v46, %v1453_v45  ;;  %v3341_v45 = vld [vmem:[%s3975_s3 + $0x30] sm:$0xff]   ;;  %v3342_v46 = vld [vmem:[%s3975_s3 + $0x28] sm:$0xff]  }
 0x202   : > { %3112 = vmatprep.subr.bf16.mxu0 %v1456_v47 }
 0x203   : > { %3113 = vmatpush3.bf16.msra.mxu0 %v1456_v47  ;;  %v1536_v48 = vpop.permute.xlu0 %1535  ;;  %v3343_v47 = vld [vmem:[%s3975_s3 + $0x20] sm:$0xff]  }
 0x204   : > { %v1534_v49 = vpop.permute.xlu1 %1533 }
 0x205   : > { %v1539_v63 = vsel %vm1537_vm10, %v1534_v49, %v1536_v48  ;;  %v3344_v48 = vld [vmem:[%s3975_s3 + $0x18] sm:$0xff]   ;;  %v3345_v49 = vld [vmem:[%s3975_s3 + $0x10] sm:$0xff]  }
 0x207   : > { %v1623_v50 = vpop.permute.xlu0 %1622 }
 0x208   : > { %v1621_v51 = vpop.permute.xlu1 %1620 }
 0x209   : > { %v1626_v5 = vsel %vm1624_vm11, %v1621_v51, %v1623_v50  ;;  %v3346_v50 = vld [vmem:[%s3975_s3 + $0x8] sm:$0xff]   ;;  %v3347_v51 = vld [vmem:[%s3975_s3] sm:$0xff]  }
 0x20b   : > { %v1820_v52 = vpop.permute.xlu0 %1819 }
 0x20c   : > { %v1818_v53 = vpop.permute.xlu1 %1817 }
 0x20d   : > { %v1822_v18 = vsel %vm636_vm2, %v1818_v53, %v1820_v52 }
 0x20f   : > { %v1906_v54 = vpop.permute.xlu0 %1905 }
 0x210   : > { %v1904_v55 = vpop.permute.xlu1 %1903 }
 0x211   : > { %v1908_v23 = vsel %vm821_vm3, %v1904_v55, %v1906_v54 }
 0x213   : > { %v3754_v56 = vpop.permute.xlu0 %1991 }
 0x214   : > { %v3756_v57 = vpop.permute.xlu1 %1989 }
 0x215   : > { %v1994_v29 = vsel %vm1006_vm4, %v3756_v57, %v3754_v56 }
 0x217   : > { %v1370_v58 = vpop.permute.xlu0 %1369 }
 0x218   : > { %v1368_v59 = vpop.permute.xlu1 %1367 }
 0x219   : > { %v1376_v60 = vsel %vm1375_vm9, %v1368_v59, %v1370_v58 }
 0x21a   : > { %3106 = vmatprep.subr.bf16.mxu1 %v1376_v60 }
 0x21b   : > { %3107 = vmatpush3.bf16.msra.mxu1 %v1376_v60  ;;  %v1449_v62 = vpop.permute.xlu0 %1448 }
 0x21c   : > { %3120 = vmatprep.subr.bf16.mxu1 %v1539_v63  ;;  %v1447_v0 = vpop.permute.xlu1 %1446 }
 0x21d   : > { %v1455_v2 = vsel %vm479_vm0, %v1447_v0, %v1449_v62 }
 0x21e   : > { %3109 = vmatmul.mubr.msk.bf16.vlgmr.msra.gmra.mxu1 %vm1380_vm8, %v3321_v61  ;;  %3114 = vmatprep.subr.bf16.mxu0 %v1455_v2 }
 0x21f   : > { %3115 = vmatpush3.bf16.msra.mxu0 %v1455_v2  ;;  %3121 = vmatpush3.bf16.msra.mxu1 %v1539_v63  ;;  %v1532_v4 = vpop.permute.xlu0 %1531 }
 0x220   : > { %3128 = vmatprep.subr.bf16.mxu0 %v1626_v5  ;;  %v1530_v6 = vpop.permute.xlu1 %1529  ;;  %3124 = vmatprep.mubr.msk.bf16.mxu1 %vm1380_vm8, %v3325_v1 }
 0x221   : > { %v1538_v8 = vsel %vm1537_vm10, %v1530_v6, %v1532_v4 }
 0x222   : > { %3117 = vmatmul.mubr.msk.bf16.vlgmr.msra.gmra.mxu0 %vm1380_vm8, %v3323_v3  ;;  %3122 = vmatprep.subr.bf16.mxu1 %v1538_v8 }
 0x223   : > { %3123 = vmatpush3.bf16.msra.mxu1 %v1538_v8  ;;  %3129 = vmatpush3.bf16.msra.mxu0 %v1626_v5  ;;  %v1619_v11 = vpop.permute.xlu0 %1618 }
 0x224   : > { %3136 = vmatprep.subr.bf16.mxu1 %v3324_v9  ;;  %v1617_v12 = vpop.permute.xlu1 %1616  ;;  %3132 = vmatprep.mubr.msk.bf16.mxu0 %vm1380_vm8, %v3328_v7 }
 0x225   : > { %v1625_v13 = vsel %vm1624_vm11, %v1617_v12, %v1619_v11 }
 0x226   : > { %3125 = vmatmul.mubr.msk.bf16.vlgmr.msra.gmra.mxu1 %vm1380_vm8, %v3326_v10  ;;  %3130 = vmatprep.subr.bf16.mxu0 %v1625_v13 }
 0x227   : > { %3131 = vmatpush3.bf16.msra.mxu0 %v1625_v13  ;;  %3137 = vmatpush3.bf16.msra.mxu1 %v3324_v9  ;;  %v2078_v17 = vpop.permute.xlu0 %2077 }
 0x228   : > { %3138 = vmatprep.subr.bf16.mxu1 %v3327_v15  ;;  %3144 = vmatprep.subr.bf16.mxu0 %v1822_v18  ;;  %v2076_v19 = vpop.permute.xlu1 %2075 }
 0x229   : > { %3140 = vmatprep.mubr.msk.bf16.mxu1 %vm1380_vm8, %v3330_v14  ;;  %v2080_v35 = vsel %vm1191_vm5, %v2076_v19, %v2078_v17 }
 0x22a   : > { %3133 = vmatmul.mubr.msk.bf16.vlgmr.msra.gmra.mxu0 %vm1380_vm8, %v3329_v16 }
 0x22b   : > { %3139 = vmatpush3.bf16.msra.mxu1 %v3327_v15  ;;  %3145 = vmatpush3.bf16.msra.mxu0 %v1822_v18  ;;  %v1816_v22 = vpop.permute.xlu0 %1815 }
 0x22c   : > { %3152 = vmatprep.subr.bf16.mxu1 %v1908_v23  ;;  %v1814_v24 = vpop.permute.xlu1 %1813  ;;  %3148 = vmatprep.mubr.msk.bf16.mxu0 %vm1380_vm8, %v3332_v20 }
 0x22d   : > { %v1821_v26 = vsel %vm636_vm2, %v1814_v24, %v1816_v22 }
 0x22e   : > { %3141 = vmatmul.mubr.msk.bf16.vlgmr.msra.gmra.mxu1 %vm1380_vm8, %v3331_v21  ;;  %3146 = vmatprep.subr.bf16.mxu0 %v1821_v26 }
 0x22f   : > { %3147 = vmatpush3.bf16.msra.mxu0 %v1821_v26  ;;  %3153 = vmatpush3.bf16.msra.mxu1 %v1908_v23  ;;  %v1902_v28 = vpop.permute.xlu0 %1901 }
 0x230   : > { %3160 = vmatprep.subr.bf16.mxu0 %v1994_v29  ;;  %v1900_v30 = vpop.permute.xlu1 %1899  ;;  %3156 = vmatprep.mubr.msk.bf16.mxu1 %vm1380_vm8, %v3334_v25 }
 0x231   : > { %v1907_v32 = vsel %vm821_vm3, %v1900_v30, %v1902_v28 }
 0x232   : > { %3149 = vmatmul.mubr.msk.bf16.vlgmr.msra.gmra.mxu0 %vm1380_vm8, %v3333_v27  ;;  %3154 = vmatprep.subr.bf16.mxu1 %v1907_v32 }
 0x233   : > { %3155 = vmatpush3.bf16.msra.mxu1 %v1907_v32  ;;  %3161 = vmatpush3.bf16.msra.mxu0 %v1994_v29  ;;  %v1988_v34 = vpop.permute.xlu0 %1987 }
 0x234   : > { %3168 = vmatprep.subr.bf16.mxu1 %v2080_v35  ;;  %v1986_v36 = vpop.permute.xlu1 %1985  ;;  %3164 = vmatprep.mubr.msk.bf16.mxu0 %vm1380_vm8, %v3336_v31 }
 0x235   : > { %v1993_v38 = vsel %vm1006_vm4, %v1986_v36, %v1988_v34 }
 0x236   : > { %3157 = vmatmul.mubr.msk.bf16.vlgmr.msra.gmra.mxu1 %vm1380_vm8, %v3335_v33  ;;  %3162 = vmatprep.subr.bf16.mxu0 %v1993_v38 }
 0x237   : > { %3163 = vmatpush3.bf16.msra.mxu0 %v1993_v38  ;;  %3169 = vmatpush3.bf16.msra.mxu1 %v2080_v35  ;;  %v2074_v40 = vpop.permute.xlu0 %2073 }
 0x238   : > { %v2072_v41 = vpop.permute.xlu1 %2071  ;;  %3172 = vmatprep.mubr.msk.bf16.mxu1 %vm1380_vm8, %v3338_v37  ;;  %3176 = vmatprep.subr.bf16.mxu0 %v3340_v44 }
 0x239   : > { %v2079_v42 = vsel %vm1191_vm5, %v2072_v41, %v2074_v40 }
 0x23a   : > { %3165 = vmatmul.mubr.msk.bf16.vlgmr.msra.gmra.mxu0 %vm1380_vm8, %v3337_v39  ;;  %3170 = vmatprep.subr.bf16.mxu1 %v2079_v42 }
 0x23b   : > { %3171 = vmatpush3.bf16.msra.mxu1 %v2079_v42  ;;  %3177 = vmatpush3.bf16.msra.mxu0 %v3340_v44 }
 0x23c   : > { %3178 = vmatprep.subr.bf16.mxu0 %v3341_v45 }
 0x23e   : > { %3173 = vmatmul.mubr.msk.bf16.vlgmr.msra.gmra.mxu1 %vm1380_vm8, %v3339_v43 }
 0x23f   : > { %3179 = vmatpush3.bf16.msra.mxu0 %v3341_v45 }
 0x240   : > { %3180 = vmatprep.subr.bf16.mxu0 %v3342_v46 }
 0x243   : > { %3181 = vmatpush3.bf16.msra.mxu0 %v3342_v46 }
 0x244   : > { %3182 = vmatprep.subr.bf16.mxu0 %v3343_v47  ;;  %v2154_v39 = vpop.permute.xlu0 %2153 }
 0x245   : > { %v2149_v46 = vpop.permute.xlu1 %2148 }
 0x247   : > { %3183 = vmatpush3.bf16.msra.mxu0 %v3343_v47 }
 0x248   : > { %3184 = vmatprep.subr.bf16.mxu0 %v3344_v48 }
 0x24b   : > { %3185 = vmatpush3.bf16.msra.mxu0 %v3344_v48 }
 0x24c   : > { %3186 = vmatprep.subr.bf16.mxu0 %v3345_v49 }
 0x24f   : > { %3187 = vmatpush3.bf16.msra.mxu0 %v3345_v49 }
 0x250   : > { %3188 = vmatprep.subr.bf16.mxu0 %v3346_v50 }
 0x253   : > { %3189 = vmatpush3.bf16.msra.mxu0 %v3346_v50 }
 0x254   : > { %3190 = vmatprep.subr.bf16.mxu0 %v3347_v51 }
 0x257   : > { %3191 = vmatpush3.bf16.msra.mxu0 %v3347_v51 }
 0x2de   : > { %v3110_v52 = vpop.f32.mrf.mxu1 }
 0x2e0   : > { %v1421_v53 = vpop.f32.mrf.mxu1 }
 0x2e2   : > { %v3111_v54 = vpop.f32.mrf.mxu1  ;;  %v3118_v55 = vpop.f32.mrf.mxu0 }
 0x2e3   : > { %v1508_v12 = vadd.f32 %v3118_v55, %v3110_v52 }
 0x2e4   : > { %v1424_v56 = vpop.f32.mrf.mxu1  ;;  %v1499_v57 = vpop.f32.mrf.mxu0 }
 0x2e5   : > { %v1500_v10 = vadd.f32 %v1499_v57, %v1421_v53  ;;  %v2164_v57 = vpop.permute.xlu0 %2163 }
 0x2e6   : > { %v3119_v58 = vpop.f32.mrf.mxu0  ;;  %v3126_v59 = vpop.f32.mrf.mxu1 }
 0x2e7   : > { %v1511_v11 = vadd.f32 %v3119_v58, %v3111_v54  ;;  %v1599_v18 = vadd.f32 %v3126_v59, %v1508_v12  ;;  %v2364_v12 = vld [vmem:[%s3982_s10] sm:$0xff] }
 0x2e8   : > { %v1502_v60 = vpop.f32.mrf.mxu0  ;;  %v1582_v61 = vpop.f32.mrf.mxu1 }
 0x2e9   : > { %v1503_v15 = vadd.f32 %v1502_v60, %v1424_v56  ;;  %v1597_v16 = vadd.f32 %v1582_v61, %v1500_v10  ;;  %v2159_v60 = vpop.permute.xlu1 %2158 }
 0x2ea   : > { %v3127_v62 = vpop.f32.mrf.mxu1  ;;  %v3134_v63 = vpop.f32.mrf.mxu0 }
 0x2eb   : > { %v1600_v17 = vadd.f32 %v3127_v62, %v1511_v11  ;;  %v1686_v24 = vadd.f32 %v3134_v63, %v1599_v18  ;;  %v2289_v11 = vld [vmem:[%s3981_s9] sm:$0x3]  ;;  %v2367_v18 = vld [vmem:[%s3982_s10 + $0x18] sm:$0xff] }
 0x2ec   : > { %v1585_v0 = vpop.f32.mrf.mxu1  ;;  %v1669_v1 = vpop.f32.mrf.mxu0 }
 0x2ed   : > { %v1598_v21 = vadd.f32 %v1585_v0, %v1503_v15  ;;  %v1684_v22 = vadd.f32 %v1669_v1, %v1597_v16  ;;  %v2365_v16 = vld [vmem:[%s3982_s10 + $0x8] sm:$0xff] }
 0x2ee   : > { %v3135_v2 = vpop.f32.mrf.mxu0  ;;  %v3142_v3 = vpop.f32.mrf.mxu1 }
 0x2ef   : > { %v1687_v23 = vadd.f32 %v3135_v2, %v1600_v17  ;;  %v1776_v30 = vadd.f32 %v3142_v3, %v1686_v24  ;;  %v3437_v2 = vmov 0.0   ;;  %v2366_v17 = vld [vmem:[%s3982_s10 + $0x10] sm:$0xff] }
 0x2f0   : > { %v1672_v4 = vpop.f32.mrf.mxu0  ;;  %v1759_v5 = vpop.f32.mrf.mxu1  ;;  %3196 = vmatprep.subr.mxu1 %v3437_v2  ;;  %3204 = vmatprep.mubr.msk.f32.mxu1 %vm3438_vm12, %v3437_v2 }
 0x2f1   : > { %v1685_v27 = vadd.f32 %v1672_v4, %v1598_v21  ;;  %v1774_v28 = vadd.f32 %v1759_v5, %v1684_v22  ;;  %v2563_v21 = vld [vmem:[%s455_s22] sm:$0x3]  ;;  %s3928_s22 = scalar_lea.hbm %s3985_s13, %s2960_s16 }
 0x2f2   : > { %v3143_v6 = vpop.f32.mrf.mxu1  ;;  %v3150_v7 = vpop.f32.mrf.mxu0 }
 0x2f3   : > { %v1777_v29 = vadd.f32 %v3143_v6, %v1687_v23  ;;  %v1882_v36 = vadd.f32 %v3150_v7, %v1776_v30 }
 0x2f4   : > { %v1762_v8 = vpop.f32.mrf.mxu1  ;;  %v1865_v9 = vpop.f32.mrf.mxu0 }
 0x2f5   : > { %v1775_v33 = vadd.f32 %v1762_v8, %v1685_v27  ;;  %v1880_v34 = vadd.f32 %v1865_v9, %v1774_v28 }
 0x2f6   : > { %v3151_v13 = vpop.f32.mrf.mxu0  ;;  %v3158_v14 = vpop.f32.mrf.mxu1 }
 0x2f7   : > { %v1883_v35 = vadd.f32 %v3151_v13, %v1777_v29  ;;  %v1968_v43 = vadd.f32 %v3158_v14, %v1882_v36 }
 0x2f8   : > { %v1868_v19 = vpop.f32.mrf.mxu0  ;;  %v1951_v20 = vpop.f32.mrf.mxu1 }
 0x2f9   : > { %v1881_v40 = vadd.f32 %v1868_v19, %v1775_v33  ;;  %v1966_v41 = vadd.f32 %v1951_v20, %v1880_v34  ;;  %v2495_v19 = vld [vmem:[%s3976_s4] sm:$0x1] }
 0x2fa   : > { %v3159_v25 = vpop.f32.mrf.mxu1  ;;  %v3166_v26 = vpop.f32.mrf.mxu0  ;;  %v2504_v20 = vsel %vm2502_vm13, %v2495_v19, 0 }
 0x2fb   : > { %v1969_v42 = vadd.f32 %v3159_v25, %v1883_v35  ;;  %v2054_v50 = vadd.f32 %v3166_v26, %v1968_v43  ;;  %v3348_v43 = vld [vmem:[%s3983_s11] sm:$0xff]  }
 0x2fc   : > { %v1954_v31 = vpop.f32.mrf.mxu1  ;;  %v2037_v32 = vpop.f32.mrf.mxu0 }
 0x2fd   : > { %v1967_v47 = vadd.f32 %v1954_v31, %v1881_v40  ;;  %v2052_v48 = vadd.f32 %v2037_v32, %v1966_v41 }
 0x2fe   : > { %v3167_v37 = vpop.f32.mrf.mxu0  ;;  %v3174_v38 = vpop.f32.mrf.mxu1 }
 0x2ff   : > { %v2055_v49 = vadd.f32 %v3167_v37, %v1969_v42  ;;  %v2140_v55 = vadd.f32 %v3174_v38, %v2054_v50 }
 0x300   : > { %v2040_v44 = vpop.f32.mrf.mxu0  ;;  %v2123_v45 = vpop.f32.mrf.mxu1 }
 0x301   : > { %v2053_v52 = vadd.f32 %v2040_v44, %v1967_v47  ;;  %v2138_v53 = vadd.f32 %v2123_v45, %v2052_v48  ;;  %v3868_v63 = vadd.f32 %v2159_v60, %v2140_v55  ;;  %v2605_v45 = vsel %vm486_vm1, %v2563_v21, 0  ;;  %v2571_v48 = vpop.permute.xlu1 %2570 }
 0x302   : > { %v3175_v51 = vpop.f32.mrf.mxu1 }
 0x303   : > { %v2141_v54 = vadd.f32 %v3175_v51, %v2055_v49  ;;  %v3864_v61 = vadd.f32 %v2149_v46, %v2138_v53  ;;  %v3349_v46 = vld [vmem:[%s3983_s11 + $0x8] sm:$0xff]   ;;  %v2576_v51 = vpop.permute.xlu0 %2575 }
 0x304   : > { %v2126_v56 = vpop.f32.mrf.mxu1 }
 0x305   : > { %v2139_v58 = vadd.f32 %v2126_v56, %v2053_v52  ;;  %v3862_v59 = vadd.f32 %v2164_v57, %v2141_v54  ;;  %v2581_v53 = vpop.permute.xlu1 %2580 }
 0x307   : > { %v3866_v62 = vadd.f32 %v2154_v39, %v2139_v58  ;;  %v2171_v1 = vpack.c.bf16 %v3862_v59, %v3868_v63 }
 0x309   : > { %v2170_v0 = vpack.c.bf16 %v3866_v62, %v3864_v61 }
 0x30b   : > { %3192 = vmatprep.mubr.bf16.mxu0 %v2170_v0 }
 0x30c   : > { %3193 = vmatmul.mubr.bf16.vlgmr.msra.gmra.mxu0 %v2171_v1  ;;  %v2586_v1 = vpop.permute.xlu0 %2585 }
 0x3cc   : > { %v3194_v3 = vpop.f32.mrf.mxu0 }
 0x3cd   : > { %v2287_v8 = vmul.f32 0.125, %v3194_v3 }
 0x3ce   : > { %v2270_v4 = vpop.f32.mrf.mxu0 }
 0x3cf   : > { %v2285_v10 = vmul.f32 0.125, %v2270_v4 }
 0x3d0   : > { %v3195_v5 = vpop.f32.mrf.mxu0 }
 0x3d1   : > { %v2288_v6 = vmul.f32 0.125, %v3195_v5 }
 0x3d2   : > { %v2273_v7 = vpop.f32.mrf.mxu0 }
 0x3d3   : > { %3197 = vmatpush3.msra.mxu1 %v2288_v6  ;;  %v2286_v9 = vmul.f32 0.125, %v2273_v7 }
 0x3d4   : > { %3198 = vmatprep.subr.mxu1 %v3437_v2 }
 0x3d5   : > { %3199 = vmatpush3.msra.mxu1 %v2287_v8 }
 0x3d6   : > { %3200 = vmatprep.subr.mxu1 %v3437_v2 }
 0x3d7   : > { %3201 = vmatpush3.msra.mxu1 %v2286_v9 }
 0x3d8   : > { %3202 = vmatprep.subr.mxu1 %v3437_v2 }
 0x3d9   : > { %3203 = vmatpush3.msra.mxu1 %v2285_v10 }
 0x3da   : > { %3205 = vmatmul.mubr.msk.f32.vlgmr.msra.gmra.mxu1 %vm1380_vm8, %v2289_v11 }
 0x3db   : > { %3209 = vmatprep.mubr.msk.f32.mxu1 %vm1537_vm10, %v2364_v12 }
 0x49a   : > { %v2359_v13 = vpop.f32.mrf.mxu1 }
 0x49b   : > { %v2363_v14 = vmax.f32 %v2359_v13, 0.0 }
 0x49c   : > { %v3206_v15 = vpop.f32.mrf.mxu1 }
 0x49d   : > { %3207 = vmatprep.subr.msk.mxu1 %vm486_vm1, %v2363_v14 }
 0x49e   : > { %3208 = vmatpush3.msk.msra.mxu1 %vm486_vm1, %v2363_v14 }
 0x49f   : > { %3210 = vmatmul.mubr.msk.f32.vlgmr.msra.gmra.mxu1 %vm1537_vm10, %v2365_v16  ;;  %3236 = vmatprep.subr.msk.bf16.mxu1 %vm2502_vm13, %v2495_v19 }
 0x4a0   : > { %3212 = vmatprep.mubr.msk.f32.mxu1 %vm1537_vm10, %v2366_v17  ;;  %3216 = vmatpush3.bf16.msra.mxu1 %v2504_v20 }
 0x4a1   : > { %3237 = vmatprep.subr.msk.bf16.mxu1 %vm486_vm1, %v2563_v21 }
 0x4a3   : > { %3213 = vmatmul.mubr.msk.f32.gmra.mxu1 %vm1537_vm10, %v2367_v18 }
 0x55f   : > { %v3211_v22 = vpop.f32.mrf.mxu1 }
 0x560   : > { %v2941_v23 = vmul.f32 -1.442695, %v3211_v22 }
 0x561   : > { %v2450_v24 = vpop.f32.mrf.mxu1 }
 0x562   : > { %3350 = vpow2.f32 %v2941_v23  ;;  %v2940_v25 = vmul.f32 -1.442695, %v2450_v24 }
 0x563   : > { %v3214_v26 = vpop.f32.mrf.mxu1 }
 0x564   : > { %3352 = vpow2.f32 %v2940_v25  ;;  %v2943_v27 = vmul.f32 -1.442695, %v3214_v26 }
 0x565   : > { %v2460_v28 = vpop.f32.mrf.mxu1 }
 0x566   : > { %3354 = vpow2.f32 %v2943_v27  ;;  %v2942_v29 = vmul.f32 -1.442695, %v2460_v28 }
 0x568   : > { %3356 = vpow2.f32 %v2942_v29 }
 0x56f   : > { %v3351_v30 = vpop.eup %3350 }
 0x570   : > { %v2482_v31 = vadd.f32 1.0, %v3351_v30 }
 0x571   : > { %v3353_v32 = vpop.eup %3352 }
 0x572   : > { %v2481_v33 = vadd.f32 1.0, %v3353_v32  ;;  %3358 = vrcp.f32 %v2482_v31 }
 0x573   : > { %v3355_v34 = vpop.eup %3354 }
 0x574   : > { %3360 = vrcp.f32 %v2481_v33  ;;  %v2484_v35 = vadd.f32 1.0, %v3355_v34 }
 0x575   : > { %v3357_v36 = vpop.eup %3356 }
 0x576   : > { %v2483_v37 = vadd.f32 1.0, %v3357_v36  ;;  %3362 = vrcp.f32 %v2484_v35 }
 0x578   : > { %3364 = vrcp.f32 %v2483_v37 }
 0x57f   : > { %v3359_v38 = vpop.eup %3358 }
 0x581   : > { %v3361_v39 = vpop.eup %3360 }
 0x582   : > { %v2493_v40 = vpack.c.bf16 %v3359_v38, %v3361_v39 }
 0x583   : > { %v3363_v41 = vpop.eup %3362 }
 0x584   : > { %3217 = vmatprep.mubr.msk.bf16.mxu1 %vm1537_vm10, %v2493_v40 }
 0x585   : > { %v3365_v42 = vpop.eup %3364 }
 0x586   : > { %v2494_v44 = vpack.c.bf16 %v3363_v41, %v3365_v42 }
 0x588   : > { %3218 = vmatmul.mubr.msk.bf16.vlgmr.msra.gmra.mxu1 %vm1537_vm10, %v2494_v44 }
 0x589   : > { %3222 = vmatpush3.bf16.msra.mxu1 %v2605_v45  ;;  %3223 = vmatprep.mubr.msk.bf16.mxu1 %vm479_vm0, %v3348_v43 }
 0x590   : > { %3224 = vmatmul.mubr.msk.bf16.vlgmr.msra.gmra.mxu1 %vm479_vm0, %v3349_v46 }
 0x648   : > { %v3219_v47 = vpop.f32.mrf.mxu1 }
 0x649   : > { %v2557_v55 = vmul.f32 %v3219_v47, %v3868_v63 }
 0x64a   : > { %v2540_v49 = vpop.f32.mrf.mxu1 }
 0x64b   : > { %v2555_v58 = vmul.f32 %v2540_v49, %v3864_v61 }
 0x64c   : > { %v3220_v50 = vpop.f32.mrf.mxu1 }
 0x64d   : > { %v2558_v3 = vmul.f32 %v3220_v50, %v3862_v59 }
 0x64e   : > { %v2543_v52 = vpop.f32.mrf.mxu1 }
 0x64f   : > { %v2556_v8 = vmul.f32 %v2543_v52, %v3866_v62 }
 0x650   : > { %v3225_v54 = vpop.f32.mrf.mxu1 }
 0x651   : > { %v2650_v56 = vadd.f32 %v3225_v54, %v2581_v53 }
 0x652   : > { %v2641_v57 = vpop.f32.mrf.mxu1 }
 0x653   : > { %v2658_v60 = vadd.f32 %v2650_v56, %v2557_v55  ;;  %v2642_v0 = vadd.f32 %v2641_v57, %v2571_v48 }
 0x654   : > { %v3226_v2 = vpop.f32.mrf.mxu1 }
 0x655   : > { %v2662_v4 = vmax.f32 %v2658_v60, 0.0  ;;  %v2656_v5 = vadd.f32 %v2642_v0, %v2555_v58  ;;  %v2653_v6 = vadd.f32 %v3226_v2, %v2586_v1 }
 0x656   : > { %v2644_v7 = vpop.f32.mrf.mxu1 }
 0x657   : > { %2666 = vst [vmem:[%s446_s20 + $0x10] sm:$0xff] %v2662_v4  ;;  %v2660_v63 = vmax.f32 %v2656_v5, 0.0  ;;  %v2659_v61 = vadd.f32 %v2653_v6, %v2558_v3  ;;  %v2645_v9 = vadd.f32 %v2644_v7, %v2576_v51 }
 0x659   : > { %2664 = vst [vmem:[%s446_s20] sm:$0xff] %v2660_v63  ;;  %v2663_v10 = vmax.f32 %v2659_v61, 0.0  ;;  %v2657_v11 = vadd.f32 %v2645_v9, %v2556_v8 }
 0x65b   : > { %2667 = vst [vmem:[%s446_s20 + $0x18] sm:$0xff] %v2663_v10  ;;  %v2661_v59 = vmax.f32 %v2657_v11, 0.0 }
 0x65d   : > { %2665 = vst [vmem:[%s446_s20 + $0x8] sm:$0xff] %v2661_v59 }
 0x65e   : > { %3379 = shalt.err (!%p3376_p3)
}
 0x65f   : > { %s3380_s17 = scalar_lea.hbm %s3928_s22, 512  ;;  %s3384_s16 = scalar_lea.hbm %s3985_s13, 1024 }
 0x660   : > { %p3381_p4 = scmp.ne.s32.totalorder %s3928_s22, %s3380_s17  ;;  %p3385_p9 = scmp.lt.s32.totalorder %s3928_s22, %s3985_s13 }
 0x661   : > { %p3386_p10 = scmp.lt.s32.totalorder %s3384_s16, %s3380_s17 }
 0x662   : > { %p3382_p7 = pnand %p3381_p4, %p3550_p5 }
 0x663   : > { %p3387_p11 = por %p3386_p10, %p3385_p9 }
 0x664   : > { %p3383_p8 = pneg %p3382_p7 }
 0x666   : > { %p3388_p12 = pnand %p3387_p11, %p3383_p8 }
 0x668   : > { %3391 = shalt.err (!%p3388_p12)
}
 0x669   : > { %s3440_s29 = smov 128   ;;  %s3441_s27 = smov 8  }
 0x66a   : > { %3238 = dma.vmem_to_hbm [thread:$0]  (%p3550_p5), %s3923_s21, 512, %s3928_s22, %s3932_s24, %s3440_s29, %s3440_s29, %s3441_s27  }
 0x66b PF: > { %p3244_p13 = scmp.ge.s32.totalorder %s3426_s28, 2  ;;  %s2697_s23 = sand.u32 1, %s3414_s25  }
 0x66c   : > { %s2698_s15 = scalar_lea.sflag [#allocation4], %s2697_s23 }
 0x66d   : > { %p3241_p0 = pnand %p3244_p13, %p3554_p6 }
 0x66f   : > { %p3242_p1 = pneg %p3241_p0 }
 0x671   : > { %3409 = dma.done.wait (%p3242_p1), %s2698_s15, 512  }
 0x672   : > { %3411 = vsyncadd (%p3242_p1), %s2698_s15, 4294966784  ;;  %s4007_s17 = sld [smem:[#allocation6_spill]]  ;;  %p23_p2 = scmp.ge.s32.totalorder %s3537_s14, 4  }
 0x673   : > { %s4008_s27 = sld [smem:[#allocation7_spill]]  ;;  %s4009_s25 = smov %s3418_s26 }
 0x674   : > { %s4011_s28 = smov %s3537_s14  ;;  %25 = sbr.rel (!%p23_p2) target bundleno = 6 (0x6), region = 127 }
 0x678   : > { %s4010_s26 = smov %s4007_s17 }
 0x679   :  { %2703 = vsyncpa [#allocation4], 1 }
 0x67a   :  { %2705 = vsyncpa [#allocation4 + $0x1], 1 }

</bundles_post_ra>
